<compile_context>
chip_gen: v6e
topology: v6e:2x2x1
jax: 0.10.0
libtpu: 0.0.40
codegen_flags: <defaults>
</compile_context>

<pallas_src>
from functools import partial

import jax
import jax.numpy as jnp
from jax import lax
from jax.experimental import pallas as pl
from jax.experimental.pallas import tpu as pltpu

EPS = 1e-12  # torch.nn.functional.normalize default eps


def _round_up(x, m):
    return ((x + m - 1) // m) * m


# ----------------------------------------------------------------------------
# Fused pairwise-MLP kernel.
#   M[i, j] = relu( sum_h relu( (A[i,h] + b1[h])  (+/-)  B[j,h] ) * w2[h] + b2 )
# followed by an optional row L1 normalization.  Grid = (source, row_block);
# output block is a lane-dense (tm, Nc) slab with j on lanes.
# ----------------------------------------------------------------------------
def _pair_mlp_kernel(a_ref, bt_ref, w2_ref, b2_ref, o_ref, *,
                     h_dim, n_valid, row_norm):
    tm, nc = o_ref.shape
    # Fold b2 into the accumulator init; final ReLU applied after the loop.
    acc = jnp.full((tm, nc), b2_ref[0], dtype=jnp.float32)
    # H is the leading (non-vreg) axis: per h, a lane-broadcast column of A
    # meets a sublane-broadcast row of B_T, and the second Linear is a running
    # scalar FMA.  No (tm, N, H) intermediate, no XLU cross-lane reduce.
    # TODO(synk): for very large emb, switch to lax.fori_loop + pl.ds slicing
    # to bound unrolled code size.
    for h in range(h_dim):
        col = a_ref[:, h:h + 1]        # (tm, 1)   A[i,h] + b1[h]
        row = bt_ref[h:h + 1, :]       # (1, nc)   (+/-) B[j,h]  (sign pre-folded)
        acc = acc + jnp.maximum(col + row, 0.0) * w2_ref[h]
    y = jnp.maximum(acc, 0.0)
    if row_norm:
        if nc != n_valid:
            # Zero the padded lanes so they don't pollute the row L1 mass.
            mask = lax.broadcasted_iota(jnp.int32, (tm, nc), 1) < n_valid
            y = jnp.where(mask, y, 0.0)
        rowsum = jnp.sum(y, axis=1, keepdims=True)
        y = y * pl.reciprocal(jnp.maximum(rowsum, EPS), approx=True)
    o_ref[...] = y


# ----------------------------------------------------------------------------
# pallas_call wrapper
# ----------------------------------------------------------------------------
def _pick_row_tile(nr, nc, h, budget_bytes=6 << 20):
    """Largest row tile tm (multiple of 8, dividing nr) whose resident VMEM
    footprint (double-buffered A block + output block + resident B_T, f32)
    stays under `budget_bytes`.  6 MiB keeps well inside every generation's
    scoped VMEM default (incl. v7x's per-TC budget under megacore sharding)."""
    candidates = [t for t in (8, 16, 32, 64, 128, 256, 512)
                  if t <= nr and nr % t == 0]
    if nr not in candidates:
        candidates.append(nr)          # nr is always a multiple of 8 (padded)
    best = 8
    for t in sorted(candidates):
        cost = 8 * (t * h) + 8 * (t * nc) + 8 * (h * nc)
        if cost <= budget_bytes:
            best = t
    return best


def _call_pair_mlp(a_b, bt, w2, b2, *, n_valid, row_norm):
    s, nr, h = a_b.shape
    nc = bt.shape[-1]
    tm = _pick_row_tile(nr, nc, h)
    grid = (s, nr // tm)
    kernel = partial(_pair_mlp_kernel, h_dim=h, n_valid=n_valid,
                     row_norm=row_norm)
    return pl.pallas_call(
        kernel,
        out_shape=jax.ShapeDtypeStruct((s, nr, nc), jnp.float32),
        grid=grid,
        in_specs=[
            pl.BlockSpec((None, tm, h), lambda si, ii: (si, ii, 0)),   # A rows
            pl.BlockSpec((None, h, nc), lambda si, ii: (si, 0, 0)),    # B_T resident
            pl.BlockSpec(memory_space=pltpu.MemorySpace.SMEM),         # w2 (H,)
            pl.BlockSpec(memory_space=pltpu.MemorySpace.SMEM),         # b2 (1,)
        ],
        out_specs=pl.BlockSpec((None, tm, nc), lambda si, ii: (si, ii, 0)),
        compiler_params=pltpu.CompilerParams(
            dimension_semantics=("parallel", "parallel")),
    )(a_b, bt, w2, b2)


# ----------------------------------------------------------------------------
# XLA precompute (tiny (N,E)@(E,H) matmuls; no Pallas needed at these sizes)
# ----------------------------------------------------------------------------
def _prep_diff(z, w1, b1):
    """Diff path: fold the column-L1 normalization of the pairwise-difference
    tensor into z using the sorted-order identity, then pre-project."""
    n = z.shape[1]
    zs = jnp.sort(z, axis=1)                                   # per-column sort
    coef = 2.0 * jnp.arange(n, dtype=jnp.float32) - (n - 1.0)  # 2i - (N-1)
    colsum = 2.0 * jnp.sum(coef[None, :, None] * zs, axis=1, keepdims=True)
    z_scaled = z / jnp.maximum(colsum, EPS)
    a = jnp.einsum('sne,eh->snh', z_scaled, w1,
                   precision=lax.Precision.HIGHEST)            # (2, N, H)
    a_b = a + b1                                               # b1 folded into A
    bt = -jnp.swapaxes(a, 1, 2)                                # (2, H, N), sign folded
    return a_b, bt


def _prep_concat(z, w1, b1):
    """Concat path: concat(z[i], z[j]) @ W1 = z[i] @ W1[:E] + z[j] @ W1[E:]."""
    e = z.shape[-1]
    a_b = jnp.einsum('sne,eh->snh', z, w1[:e],
                     precision=lax.Precision.HIGHEST) + b1     # b1 folded
    b = jnp.einsum('sne,eh->snh', z, w1[e:],
                   precision=lax.Precision.HIGHEST)
    bt = jnp.swapaxes(b, 1, 2)                                 # (2, H, N)
    return a_b, bt


# ----------------------------------------------------------------------------
# Parameter init (deterministic, PyTorch-Linear-like scaling; weights stored
# already transposed as (in_features, out_features))
# ----------------------------------------------------------------------------
def init_dsa_params(key, emb):
    keys = jax.random.split(key, 8)

    def linear(k_w, k_b, fan_in, fan_out):
        bound = 1.0 / jnp.sqrt(fan_in)
        w = jax.random.uniform(k_w, (fan_in, fan_out), jnp.float32, -bound, bound)
        b = jax.random.uniform(k_b, (1, fan_out), jnp.float32, -bound, bound)
        return w, b

    # discriminator: Linear(2E -> E), ReLU, Linear(E -> 1), ReLU
    d1_w1, d1_b1 = linear(keys[0], keys[1], 2 * emb, emb)
    d1_w2, d1_b2 = linear(keys[2], keys[3], emb, 1)
    # discriminator2: Linear(E -> E), ReLU, Linear(E -> 1), ReLU
    d2_w1, d2_b1 = linear(keys[4], keys[5], emb, emb)
    d2_w2, d2_b2 = linear(keys[6], keys[7], emb, 1)

    return {
        "disc1": (d1_w1, d1_b1, d1_w2, d1_b2),
        "disc2": (d2_w1, d2_b1, d2_w2, d2_b2),
    }


# ----------------------------------------------------------------------------
# DSA.forward
# ----------------------------------------------------------------------------
def dsa_forward(z1, z2, params, concat=False):
    """Returns [M0, M1, M2, M3]. In the reference, M2/M3 repeat the (z1,z1) /
    (z2,z2) pairs (the differing `expand` width argument is a no-op), so the
    unique work is done once per source and the results are reused."""
    z = jnp.stack([jnp.asarray(z1, jnp.float32),
                   jnp.asarray(z2, jnp.float32)], axis=0)          # (2, N, E)
    n = z.shape[1]
    nr = _round_up(n, 8)       # sublane-aligned row padding
    nc = _round_up(n, 128)     # lane-dense output stores (no masked vst)

    if concat:
        w1, b1, w2, b2 = params["disc1"]                           # w1: (2E, H)
        a_b, bt = _prep_concat(z, w1, b1)
        row_norm = False
    else:
        w1, b1, w2, b2 = params["disc2"]                           # w1: (E, H)
        a_b, bt = _prep_diff(z, w1, b1)
        row_norm = True

    if nr != n:
        a_b = jnp.pad(a_b, ((0, 0), (0, nr - n), (0, 0)))
    if nc != n:
        bt = jnp.pad(bt, ((0, 0), (0, 0), (0, nc - n)))

    out = _call_pair_mlp(a_b, bt, w2.reshape(-1), b2.reshape(-1),
                         n_valid=n, row_norm=row_norm)             # (2, nr, nc)
    m = out[:, :n, :n]
    m0, m1 = m[0], m[1]
    return [m0, m1, m0, m1]


# ----------------------------------------------------------------------------
# Pure-JAX reference of the original PyTorch forward (for validation only)
# ----------------------------------------------------------------------------
def _reference_forward(z1, z2, params, concat):
    n, e = z1.shape

    def mlp(x, w1, b1, w2, b2):
        h = jnp.maximum(x @ w1 + b1, 0.0)
        return jnp.maximum(h @ w2 + b2, 0.0)

    pairs = [(z1, z1), (z2, z2), (z1, z1), (z2, z2)]
    outs = []
    if concat:
        w1, b1, w2, b2 = params["disc1"]
        for za, zb in pairs:
            x = jnp.concatenate(
                [jnp.broadcast_to(za[:, None, :], (n, n, e)),
                 jnp.broadcast_to(zb[None, :, :], (n, n, e))], axis=-1
            ).reshape(n * n, 2 * e)
            outs.append(mlp(x, w1, b1, w2, b2).reshape(n, n))
    else:
        w1, b1, w2, b2 = params["disc2"]
        for za, zb in pairs:
            x = (za[:, None, :] - zb[None, :, :]).reshape(n * n, e)
            x = x / jnp.maximum(jnp.sum(jnp.abs(x), axis=0, keepdims=True), EPS)
            m = mlp(x, w1, b1, w2, b2).reshape(n, n)
            m = m / jnp.maximum(jnp.sum(jnp.abs(m), axis=1, keepdims=True), EPS)
            outs.append(m)
    return outs


# ----------------------------------------------------------------------------
if __name__ == "__main__":
    N, EMB = 8, 32

    key = jax.random.PRNGKey(0)
    k_z1, k_z2, k_p = jax.random.split(key, 3)
    z1 = jax.random.normal(k_z1, (N, EMB), jnp.float32)
    z2 = jax.random.normal(k_z2, (N, EMB), jnp.float32)
    params = init_dsa_params(k_p, EMB)

    fwd = jax.jit(dsa_forward, static_argnames=("concat",))

    ms = [jax.block_until_ready(m) for m in fwd(z1, z2, params, concat=False)]
    ms_c = [jax.block_until_ready(m) for m in fwd(z1, z2, params, concat=True)]
    assert all(m.shape == (N, N) for m in ms + ms_c)

    # Validate against a straightforward XLA implementation of the reference.
    ref = _reference_forward(z1, z2, params, concat=False)
    ref_c = _reference_forward(z1, z2, params, concat=True)
    max_err = max(float(jnp.max(jnp.abs(g - w)))
                  for g, w in zip(ms + ms_c, ref + ref_c))
    assert max_err < 5e-3, max_err

    print("KERNEL_OK")
</pallas_src>

<mosaic_0001>
module attributes {stable_mosaic.version = 11 : i64} {
  func.func @_pair_mlp_kernel(%arg0: i32, %arg1: i32, %arg2: memref<1x8x32xf32, #tpu.memory_space<vmem>>, %arg3: memref<1x32x128xf32, #tpu.memory_space<vmem>>, %arg4: memref<32xf32, #tpu.memory_space<smem>>, %arg5: memref<1xf32, #tpu.memory_space<smem>>, %arg6: memref<1x8x128xf32, #tpu.memory_space<vmem>>) attributes {dimension_semantics = [#tpu.dimension_semantics<parallel>, #tpu.dimension_semantics<parallel>], iteration_bounds = array<i64: 2, 1>, scalar_prefetch = 0 : i64, scratch_operands = 0 : i64, tpu.core_type = #tpu.core_type<tc>, window_params = [{transform_indices = @transform_0, window_bounds = array<i64: 1, 8, 32>}, {transform_indices = @transform_1, window_bounds = array<i64: 1, 32, 128>}, {transform_indices = @transform_2, window_bounds = array<i64: 32>}, {transform_indices = @transform_3, window_bounds = array<i64: 1>}, {transform_indices = @transform_4, window_bounds = array<i64: 1, 8, 128>}]} {
    %c0 = arith.constant 0 : index
    %0 = memref.load %arg5[%c0] : memref<1xf32, #tpu.memory_space<smem>>
    %1 = vector.broadcast %0 : f32 to vector<8x128xf32>
    %c0_0 = arith.constant 0 : index
    %c0_1 = arith.constant 0 : index
    %c0_2 = arith.constant 0 : index
    %2 = vector.load %arg2[%c0_0, %c0_1, %c0_2] : memref<1x8x32xf32, #tpu.memory_space<vmem>>, vector<1x8x1xf32>
    %3 = vector.shape_cast %2 : vector<1x8x1xf32> to vector<8x1xf32>
    %c0_3 = arith.constant 0 : index
    %c0_4 = arith.constant 0 : index
    %c0_5 = arith.constant 0 : index
    %4 = vector.load %arg3[%c0_3, %c0_4, %c0_5] : memref<1x32x128xf32, #tpu.memory_space<vmem>>, vector<1x1x128xf32>
    %5 = vector.shape_cast %4 : vector<1x1x128xf32> to vector<1x128xf32>
    %6 = vector.broadcast %3 : vector<8x1xf32> to vector<8x128xf32>
    %7 = vector.broadcast %5 : vector<1x128xf32> to vector<8x128xf32>
    %8 = arith.addf %6, %7 : vector<8x128xf32>
    %cst = arith.constant 0.000000e+00 : f32
    %9 = vector.broadcast %cst : f32 to vector<8x128xf32>
    %10 = arith.maximumf %8, %9 : vector<8x128xf32>
    %c0_6 = arith.constant 0 : index
    %11 = memref.load %arg4[%c0_6] : memref<32xf32, #tpu.memory_space<smem>>
    %12 = vector.broadcast %11 : f32 to vector<8x128xf32>
    %13 = arith.mulf %10, %12 : vector<8x128xf32>
    %14 = arith.addf %1, %13 : vector<8x128xf32>
    %c0_7 = arith.constant 0 : index
    %c0_8 = arith.constant 0 : index
    %c1 = arith.constant 1 : index
    %15 = vector.load %arg2[%c0_7, %c0_8, %c1] : memref<1x8x32xf32, #tpu.memory_space<vmem>>, vector<1x8x1xf32>
    %16 = vector.shape_cast %15 : vector<1x8x1xf32> to vector<8x1xf32>
    %c0_9 = arith.constant 0 : index
    %c1_10 = arith.constant 1 : index
    %c0_11 = arith.constant 0 : index
    %17 = vector.load %arg3[%c0_9, %c1_10, %c0_11] : memref<1x32x128xf32, #tpu.memory_space<vmem>>, vector<1x1x128xf32>
    %18 = vector.shape_cast %17 : vector<1x1x128xf32> to vector<1x128xf32>
    %19 = vector.broadcast %16 : vector<8x1xf32> to vector<8x128xf32>
    %20 = vector.broadcast %18 : vector<1x128xf32> to vector<8x128xf32>
    %21 = arith.addf %19, %20 : vector<8x128xf32>
    %cst_12 = arith.constant 0.000000e+00 : f32
    %22 = vector.broadcast %cst_12 : f32 to vector<8x128xf32>
    %23 = arith.maximumf %21, %22 : vector<8x128xf32>
    %c1_13 = arith.constant 1 : index
    %24 = memref.load %arg4[%c1_13] : memref<32xf32, #tpu.memory_space<smem>>
    %25 = vector.broadcast %24 : f32 to vector<8x128xf32>
    %26 = arith.mulf %23, %25 : vector<8x128xf32>
    %27 = arith.addf %14, %26 : vector<8x128xf32>
    %c0_14 = arith.constant 0 : index
    %c0_15 = arith.constant 0 : index
    %c2 = arith.constant 2 : index
    %28 = vector.load %arg2[%c0_14, %c0_15, %c2] : memref<1x8x32xf32, #tpu.memory_space<vmem>>, vector<1x8x1xf32>
    %29 = vector.shape_cast %28 : vector<1x8x1xf32> to vector<8x1xf32>
    %c0_16 = arith.constant 0 : index
    %c2_17 = arith.constant 2 : index
    %c0_18 = arith.constant 0 : index
    %30 = vector.load %arg3[%c0_16, %c2_17, %c0_18] : memref<1x32x128xf32, #tpu.memory_space<vmem>>, vector<1x1x128xf32>
    %31 = vector.shape_cast %30 : vector<1x1x128xf32> to vector<1x128xf32>
    %32 = vector.broadcast %29 : vector<8x1xf32> to vector<8x128xf32>
    %33 = vector.broadcast %31 : vector<1x128xf32> to vector<8x128xf32>
    %34 = arith.addf %32, %33 : vector<8x128xf32>
    %cst_19 = arith.constant 0.000000e+00 : f32
    %35 = vector.broadcast %cst_19 : f32 to vector<8x128xf32>
    %36 = arith.maximumf %34, %35 : vector<8x128xf32>
    %c2_20 = arith.constant 2 : index
    %37 = memref.load %arg4[%c2_20] : memref<32xf32, #tpu.memory_space<smem>>
    %38 = vector.broadcast %37 : f32 to vector<8x128xf32>
    %39 = arith.mulf %36, %38 : vector<8x128xf32>
    %40 = arith.addf %27, %39 : vector<8x128xf32>
    %c0_21 = arith.constant 0 : index
    %c0_22 = arith.constant 0 : index
    %c3 = arith.constant 3 : index
    %41 = vector.load %arg2[%c0_21, %c0_22, %c3] : memref<1x8x32xf32, #tpu.memory_space<vmem>>, vector<1x8x1xf32>
    %42 = vector.shape_cast %41 : vector<1x8x1xf32> to vector<8x1xf32>
    %c0_23 = arith.constant 0 : index
    %c3_24 = arith.constant 3 : index
    %c0_25 = arith.constant 0 : index
    %43 = vector.load %arg3[%c0_23, %c3_24, %c0_25] : memref<1x32x128xf32, #tpu.memory_space<vmem>>, vector<1x1x128xf32>
    %44 = vector.shape_cast %43 : vector<1x1x128xf32> to vector<1x128xf32>
    %45 = vector.broadcast %42 : vector<8x1xf32> to vector<8x128xf32>
    %46 = vector.broadcast %44 : vector<1x128xf32> to vector<8x128xf32>
    %47 = arith.addf %45, %46 : vector<8x128xf32>
    %cst_26 = arith.constant 0.000000e+00 : f32
    %48 = vector.broadcast %cst_26 : f32 to vector<8x128xf32>
    %49 = arith.maximumf %47, %48 : vector<8x128xf32>
    %c3_27 = arith.constant 3 : index
    %50 = memref.load %arg4[%c3_27] : memref<32xf32, #tpu.memory_space<smem>>
    %51 = vector.broadcast %50 : f32 to vector<8x128xf32>
    %52 = arith.mulf %49, %51 : vector<8x128xf32>
    %53 = arith.addf %40, %52 : vector<8x128xf32>
    %c0_28 = arith.constant 0 : index
    %c0_29 = arith.constant 0 : index
    %c4 = arith.constant 4 : index
    %54 = vector.load %arg2[%c0_28, %c0_29, %c4] : memref<1x8x32xf32, #tpu.memory_space<vmem>>, vector<1x8x1xf32>
    %55 = vector.shape_cast %54 : vector<1x8x1xf32> to vector<8x1xf32>
    %c0_30 = arith.constant 0 : index
    %c4_31 = arith.constant 4 : index
    %c0_32 = arith.constant 0 : index
    %56 = vector.load %arg3[%c0_30, %c4_31, %c0_32] : memref<1x32x128xf32, #tpu.memory_space<vmem>>, vector<1x1x128xf32>
    %57 = vector.shape_cast %56 : vector<1x1x128xf32> to vector<1x128xf32>
    %58 = vector.broadcast %55 : vector<8x1xf32> to vector<8x128xf32>
    %59 = vector.broadcast %57 : vector<1x128xf32> to vector<8x128xf32>
    %60 = arith.addf %58, %59 : vector<8x128xf32>
    %cst_33 = arith.constant 0.000000e+00 : f32
    %61 = vector.broadcast %cst_33 : f32 to vector<8x128xf32>
    %62 = arith.maximumf %60, %61 : vector<8x128xf32>
    %c4_34 = arith.constant 4 : index
    %63 = memref.load %arg4[%c4_34] : memref<32xf32, #tpu.memory_space<smem>>
    %64 = vector.broadcast %63 : f32 to vector<8x128xf32>
    %65 = arith.mulf %62, %64 : vector<8x128xf32>
    %66 = arith.addf %53, %65 : vector<8x128xf32>
    %c0_35 = arith.constant 0 : index
    %c0_36 = arith.constant 0 : index
    %c5 = arith.constant 5 : index
    %67 = vector.load %arg2[%c0_35, %c0_36, %c5] : memref<1x8x32xf32, #tpu.memory_space<vmem>>, vector<1x8x1xf32>
    %68 = vector.shape_cast %67 : vector<1x8x1xf32> to vector<8x1xf32>
    %c0_37 = arith.constant 0 : index
    %c5_38 = arith.constant 5 : index
    %c0_39 = arith.constant 0 : index
    %69 = vector.load %arg3[%c0_37, %c5_38, %c0_39] : memref<1x32x128xf32, #tpu.memory_space<vmem>>, vector<1x1x128xf32>
    %70 = vector.shape_cast %69 : vector<1x1x128xf32> to vector<1x128xf32>
    %71 = vector.broadcast %68 : vector<8x1xf32> to vector<8x128xf32>
    %72 = vector.broadcast %70 : vector<1x128xf32> to vector<8x128xf32>
    %73 = arith.addf %71, %72 : vector<8x128xf32>
    %cst_40 = arith.constant 0.000000e+00 : f32
    %74 = vector.broadcast %cst_40 : f32 to vector<8x128xf32>
    %75 = arith.maximumf %73, %74 : vector<8x128xf32>
    %c5_41 = arith.constant 5 : index
    %76 = memref.load %arg4[%c5_41] : memref<32xf32, #tpu.memory_space<smem>>
    %77 = vector.broadcast %76 : f32 to vector<8x128xf32>
    %78 = arith.mulf %75, %77 : vector<8x128xf32>
    %79 = arith.addf %66, %78 : vector<8x128xf32>
    %c0_42 = arith.constant 0 : index
    %c0_43 = arith.constant 0 : index
    %c6 = arith.constant 6 : index
    %80 = vector.load %arg2[%c0_42, %c0_43, %c6] : memref<1x8x32xf32, #tpu.memory_space<vmem>>, vector<1x8x1xf32>
    %81 = vector.shape_cast %80 : vector<1x8x1xf32> to vector<8x1xf32>
    %c0_44 = arith.constant 0 : index
    %c6_45 = arith.constant 6 : index
    %c0_46 = arith.constant 0 : index
    %82 = vector.load %arg3[%c0_44, %c6_45, %c0_46] : memref<1x32x128xf32, #tpu.memory_space<vmem>>, vector<1x1x128xf32>
    %83 = vector.shape_cast %82 : vector<1x1x128xf32> to vector<1x128xf32>
    %84 = vector.broadcast %81 : vector<8x1xf32> to vector<8x128xf32>
    %85 = vector.broadcast %83 : vector<1x128xf32> to vector<8x128xf32>
    %86 = arith.addf %84, %85 : vector<8x128xf32>
    %cst_47 = arith.constant 0.000000e+00 : f32
    %87 = vector.broadcast %cst_47 : f32 to vector<8x128xf32>
    %88 = arith.maximumf %86, %87 : vector<8x128xf32>
    %c6_48 = arith.constant 6 : index
    %89 = memref.load %arg4[%c6_48] : memref<32xf32, #tpu.memory_space<smem>>
    %90 = vector.broadcast %89 : f32 to vector<8x128xf32>
    %91 = arith.mulf %88, %90 : vector<8x128xf32>
    %92 = arith.addf %79, %91 : vector<8x128xf32>
    %c0_49 = arith.constant 0 : index
    %c0_50 = arith.constant 0 : index
    %c7 = arith.constant 7 : index
    %93 = vector.load %arg2[%c0_49, %c0_50, %c7] : memref<1x8x32xf32, #tpu.memory_space<vmem>>, vector<1x8x1xf32>
    %94 = vector.shape_cast %93 : vector<1x8x1xf32> to vector<8x1xf32>
    %c0_51 = arith.constant 0 : index
    %c7_52 = arith.constant 7 : index
    %c0_53 = arith.constant 0 : index
    %95 = vector.load %arg3[%c0_51, %c7_52, %c0_53] : memref<1x32x128xf32, #tpu.memory_space<vmem>>, vector<1x1x128xf32>
    %96 = vector.shape_cast %95 : vector<1x1x128xf32> to vector<1x128xf32>
    %97 = vector.broadcast %94 : vector<8x1xf32> to vector<8x128xf32>
    %98 = vector.broadcast %96 : vector<1x128xf32> to vector<8x128xf32>
    %99 = arith.addf %97, %98 : vector<8x128xf32>
    %cst_54 = arith.constant 0.000000e+00 : f32
    %100 = vector.broadcast %cst_54 : f32 to vector<8x128xf32>
    %101 = arith.maximumf %99, %100 : vector<8x128xf32>
    %c7_55 = arith.constant 7 : index
    %102 = memref.load %arg4[%c7_55] : memref<32xf32, #tpu.memory_space<smem>>
    %103 = vector.broadcast %102 : f32 to vector<8x128xf32>
    %104 = arith.mulf %101, %103 : vector<8x128xf32>
    %105 = arith.addf %92, %104 : vector<8x128xf32>
    %c0_56 = arith.constant 0 : index
    %c0_57 = arith.constant 0 : index
    %c8 = arith.constant 8 : index
    %106 = vector.load %arg2[%c0_56, %c0_57, %c8] : memref<1x8x32xf32, #tpu.memory_space<vmem>>, vector<1x8x1xf32>
    %107 = vector.shape_cast %106 : vector<1x8x1xf32> to vector<8x1xf32>
    %c0_58 = arith.constant 0 : index
    %c8_59 = arith.constant 8 : index
    %c0_60 = arith.constant 0 : index
    %108 = vector.load %arg3[%c0_58, %c8_59, %c0_60] : memref<1x32x128xf32, #tpu.memory_space<vmem>>, vector<1x1x128xf32>
    %109 = vector.shape_cast %108 : vector<1x1x128xf32> to vector<1x128xf32>
    %110 = vector.broadcast %107 : vector<8x1xf32> to vector<8x128xf32>
    %111 = vector.broadcast %109 : vector<1x128xf32> to vector<8x128xf32>
    %112 = arith.addf %110, %111 : vector<8x128xf32>
    %cst_61 = arith.constant 0.000000e+00 : f32
    %113 = vector.broadcast %cst_61 : f32 to vector<8x128xf32>
    %114 = arith.maximumf %112, %113 : vector<8x128xf32>
    %c8_62 = arith.constant 8 : index
    %115 = memref.load %arg4[%c8_62] : memref<32xf32, #tpu.memory_space<smem>>
    %116 = vector.broadcast %115 : f32 to vector<8x128xf32>
    %117 = arith.mulf %114, %116 : vector<8x128xf32>
    %118 = arith.addf %105, %117 : vector<8x128xf32>
    %c0_63 = arith.constant 0 : index
    %c0_64 = arith.constant 0 : index
    %c9 = arith.constant 9 : index
    %119 = vector.load %arg2[%c0_63, %c0_64, %c9] : memref<1x8x32xf32, #tpu.memory_space<vmem>>, vector<1x8x1xf32>
    %120 = vector.shape_cast %119 : vector<1x8x1xf32> to vector<8x1xf32>
    %c0_65 = arith.constant 0 : index
    %c9_66 = arith.constant 9 : index
    %c0_67 = arith.constant 0 : index
    %121 = vector.load %arg3[%c0_65, %c9_66, %c0_67] : memref<1x32x128xf32, #tpu.memory_space<vmem>>, vector<1x1x128xf32>
    %122 = vector.shape_cast %121 : vector<1x1x128xf32> to vector<1x128xf32>
    %123 = vector.broadcast %120 : vector<8x1xf32> to vector<8x128xf32>
    %124 = vector.broadcast %122 : vector<1x128xf32> to vector<8x128xf32>
    %125 = arith.addf %123, %124 : vector<8x128xf32>
    %cst_68 = arith.constant 0.000000e+00 : f32
    %126 = vector.broadcast %cst_68 : f32 to vector<8x128xf32>
    %127 = arith.maximumf %125, %126 : vector<8x128xf32>
    %c9_69 = arith.constant 9 : index
    %128 = memref.load %arg4[%c9_69] : memref<32xf32, #tpu.memory_space<smem>>
    %129 = vector.broadcast %128 : f32 to vector<8x128xf32>
    %130 = arith.mulf %127, %129 : vector<8x128xf32>
    %131 = arith.addf %118, %130 : vector<8x128xf32>
    %c0_70 = arith.constant 0 : index
    %c0_71 = arith.constant 0 : index
    %c10 = arith.constant 10 : index
    %132 = vector.load %arg2[%c0_70, %c0_71, %c10] : memref<1x8x32xf32, #tpu.memory_space<vmem>>, vector<1x8x1xf32>
    %133 = vector.shape_cast %132 : vector<1x8x1xf32> to vector<8x1xf32>
    %c0_72 = arith.constant 0 : index
    %c10_73 = arith.constant 10 : index
    %c0_74 = arith.constant 0 : index
    %134 = vector.load %arg3[%c0_72, %c10_73, %c0_74] : memref<1x32x128xf32, #tpu.memory_space<vmem>>, vector<1x1x128xf32>
    %135 = vector.shape_cast %134 : vector<1x1x128xf32> to vector<1x128xf32>
    %136 = vector.broadcast %133 : vector<8x1xf32> to vector<8x128xf32>
    %137 = vector.broadcast %135 : vector<1x128xf32> to vector<8x128xf32>
    %138 = arith.addf %136, %137 : vector<8x128xf32>
    %cst_75 = arith.constant 0.000000e+00 : f32
    %139 = vector.broadcast %cst_75 : f32 to vector<8x128xf32>
    %140 = arith.maximumf %138, %139 : vector<8x128xf32>
    %c10_76 = arith.constant 10 : index
    %141 = memref.load %arg4[%c10_76] : memref<32xf32, #tpu.memory_space<smem>>
    %142 = vector.broadcast %141 : f32 to vector<8x128xf32>
    %143 = arith.mulf %140, %142 : vector<8x128xf32>
    %144 = arith.addf %131, %143 : vector<8x128xf32>
    %c0_77 = arith.constant 0 : index
    %c0_78 = arith.constant 0 : index
    %c11 = arith.constant 11 : index
    %145 = vector.load %arg2[%c0_77, %c0_78, %c11] : memref<1x8x32xf32, #tpu.memory_space<vmem>>, vector<1x8x1xf32>
    %146 = vector.shape_cast %145 : vector<1x8x1xf32> to vector<8x1xf32>
    %c0_79 = arith.constant 0 : index
    %c11_80 = arith.constant 11 : index
    %c0_81 = arith.constant 0 : index
    %147 = vector.load %arg3[%c0_79, %c11_80, %c0_81] : memref<1x32x128xf32, #tpu.memory_space<vmem>>, vector<1x1x128xf32>
    %148 = vector.shape_cast %147 : vector<1x1x128xf32> to vector<1x128xf32>
    %149 = vector.broadcast %146 : vector<8x1xf32> to vector<8x128xf32>
    %150 = vector.broadcast %148 : vector<1x128xf32> to vector<8x128xf32>
    %151 = arith.addf %149, %150 : vector<8x128xf32>
    %cst_82 = arith.constant 0.000000e+00 : f32
    %152 = vector.broadcast %cst_82 : f32 to vector<8x128xf32>
    %153 = arith.maximumf %151, %152 : vector<8x128xf32>
    %c11_83 = arith.constant 11 : index
    %154 = memref.load %arg4[%c11_83] : memref<32xf32, #tpu.memory_space<smem>>
    %155 = vector.broadcast %154 : f32 to vector<8x128xf32>
    %156 = arith.mulf %153, %155 : vector<8x128xf32>
    %157 = arith.addf %144, %156 : vector<8x128xf32>
    %c0_84 = arith.constant 0 : index
    %c0_85 = arith.constant 0 : index
    %c12 = arith.constant 12 : index
    %158 = vector.load %arg2[%c0_84, %c0_85, %c12] : memref<1x8x32xf32, #tpu.memory_space<vmem>>, vector<1x8x1xf32>
    %159 = vector.shape_cast %158 : vector<1x8x1xf32> to vector<8x1xf32>
    %c0_86 = arith.constant 0 : index
    %c12_87 = arith.constant 12 : index
    %c0_88 = arith.constant 0 : index
    %160 = vector.load %arg3[%c0_86, %c12_87, %c0_88] : memref<1x32x128xf32, #tpu.memory_space<vmem>>, vector<1x1x128xf32>
    %161 = vector.shape_cast %160 : vector<1x1x128xf32> to vector<1x128xf32>
    %162 = vector.broadcast %159 : vector<8x1xf32> to vector<8x128xf32>
    %163 = vector.broadcast %161 : vector<1x128xf32> to vector<8x128xf32>
    %164 = arith.addf %162, %163 : vector<8x128xf32>
    %cst_89 = arith.constant 0.000000e+00 : f32
    %165 = vector.broadcast %cst_89 : f32 to vector<8x128xf32>
    %166 = arith.maximumf %164, %165 : vector<8x128xf32>
    %c12_90 = arith.constant 12 : index
    %167 = memref.load %arg4[%c12_90] : memref<32xf32, #tpu.memory_space<smem>>
    %168 = vector.broadcast %167 : f32 to vector<8x128xf32>
    %169 = arith.mulf %166, %168 : vector<8x128xf32>
    %170 = arith.addf %157, %169 : vector<8x128xf32>
    %c0_91 = arith.constant 0 : index
    %c0_92 = arith.constant 0 : index
    %c13 = arith.constant 13 : index
    %171 = vector.load %arg2[%c0_91, %c0_92, %c13] : memref<1x8x32xf32, #tpu.memory_space<vmem>>, vector<1x8x1xf32>
    %172 = vector.shape_cast %171 : vector<1x8x1xf32> to vector<8x1xf32>
    %c0_93 = arith.constant 0 : index
    %c13_94 = arith.constant 13 : index
    %c0_95 = arith.constant 0 : index
    %173 = vector.load %arg3[%c0_93, %c13_94, %c0_95] : memref<1x32x128xf32, #tpu.memory_space<vmem>>, vector<1x1x128xf32>
    %174 = vector.shape_cast %173 : vector<1x1x128xf32> to vector<1x128xf32>
    %175 = vector.broadcast %172 : vector<8x1xf32> to vector<8x128xf32>
    %176 = vector.broadcast %174 : vector<1x128xf32> to vector<8x128xf32>
    %177 = arith.addf %175, %176 : vector<8x128xf32>
    %cst_96 = arith.constant 0.000000e+00 : f32
    %178 = vector.broadcast %cst_96 : f32 to vector<8x128xf32>
    %179 = arith.maximumf %177, %178 : vector<8x128xf32>
    %c13_97 = arith.constant 13 : index
    %180 = memref.load %arg4[%c13_97] : memref<32xf32, #tpu.memory_space<smem>>
    %181 = vector.broadcast %180 : f32 to vector<8x128xf32>
    %182 = arith.mulf %179, %181 : vector<8x128xf32>
    %183 = arith.addf %170, %182 : vector<8x128xf32>
    %c0_98 = arith.constant 0 : index
    %c0_99 = arith.constant 0 : index
    %c14 = arith.constant 14 : index
    %184 = vector.load %arg2[%c0_98, %c0_99, %c14] : memref<1x8x32xf32, #tpu.memory_space<vmem>>, vector<1x8x1xf32>
    %185 = vector.shape_cast %184 : vector<1x8x1xf32> to vector<8x1xf32>
    %c0_100 = arith.constant 0 : index
    %c14_101 = arith.constant 14 : index
    %c0_102 = arith.constant 0 : index
    %186 = vector.load %arg3[%c0_100, %c14_101, %c0_102] : memref<1x32x128xf32, #tpu.memory_space<vmem>>, vector<1x1x128xf32>
    %187 = vector.shape_cast %186 : vector<1x1x128xf32> to vector<1x128xf32>
    %188 = vector.broadcast %185 : vector<8x1xf32> to vector<8x128xf32>
    %189 = vector.broadcast %187 : vector<1x128xf32> to vector<8x128xf32>
    %190 = arith.addf %188, %189 : vector<8x128xf32>
    %cst_103 = arith.constant 0.000000e+00 : f32
    %191 = vector.broadcast %cst_103 : f32 to vector<8x128xf32>
    %192 = arith.maximumf %190, %191 : vector<8x128xf32>
    %c14_104 = arith.constant 14 : index
    %193 = memref.load %arg4[%c14_104] : memref<32xf32, #tpu.memory_space<smem>>
    %194 = vector.broadcast %193 : f32 to vector<8x128xf32>
    %195 = arith.mulf %192, %194 : vector<8x128xf32>
    %196 = arith.addf %183, %195 : vector<8x128xf32>
    %c0_105 = arith.constant 0 : index
    %c0_106 = arith.constant 0 : index
    %c15 = arith.constant 15 : index
    %197 = vector.load %arg2[%c0_105, %c0_106, %c15] : memref<1x8x32xf32, #tpu.memory_space<vmem>>, vector<1x8x1xf32>
    %198 = vector.shape_cast %197 : vector<1x8x1xf32> to vector<8x1xf32>
    %c0_107 = arith.constant 0 : index
    %c15_108 = arith.constant 15 : index
    %c0_109 = arith.constant 0 : index
    %199 = vector.load %arg3[%c0_107, %c15_108, %c0_109] : memref<1x32x128xf32, #tpu.memory_space<vmem>>, vector<1x1x128xf32>
    %200 = vector.shape_cast %199 : vector<1x1x128xf32> to vector<1x128xf32>
    %201 = vector.broadcast %198 : vector<8x1xf32> to vector<8x128xf32>
    %202 = vector.broadcast %200 : vector<1x128xf32> to vector<8x128xf32>
    %203 = arith.addf %201, %202 : vector<8x128xf32>
    %cst_110 = arith.constant 0.000000e+00 : f32
    %204 = vector.broadcast %cst_110 : f32 to vector<8x128xf32>
    %205 = arith.maximumf %203, %204 : vector<8x128xf32>
    %c15_111 = arith.constant 15 : index
    %206 = memref.load %arg4[%c15_111] : memref<32xf32, #tpu.memory_space<smem>>
    %207 = vector.broadcast %206 : f32 to vector<8x128xf32>
    %208 = arith.mulf %205, %207 : vector<8x128xf32>
    %209 = arith.addf %196, %208 : vector<8x128xf32>
    %c0_112 = arith.constant 0 : index
    %c0_113 = arith.constant 0 : index
    %c16 = arith.constant 16 : index
    %210 = vector.load %arg2[%c0_112, %c0_113, %c16] : memref<1x8x32xf32, #tpu.memory_space<vmem>>, vector<1x8x1xf32>
    %211 = vector.shape_cast %210 : vector<1x8x1xf32> to vector<8x1xf32>
    %c0_114 = arith.constant 0 : index
    %c16_115 = arith.constant 16 : index
    %c0_116 = arith.constant 0 : index
    %212 = vector.load %arg3[%c0_114, %c16_115, %c0_116] : memref<1x32x128xf32, #tpu.memory_space<vmem>>, vector<1x1x128xf32>
    %213 = vector.shape_cast %212 : vector<1x1x128xf32> to vector<1x128xf32>
    %214 = vector.broadcast %211 : vector<8x1xf32> to vector<8x128xf32>
    %215 = vector.broadcast %213 : vector<1x128xf32> to vector<8x128xf32>
    %216 = arith.addf %214, %215 : vector<8x128xf32>
    %cst_117 = arith.constant 0.000000e+00 : f32
    %217 = vector.broadcast %cst_117 : f32 to vector<8x128xf32>
    %218 = arith.maximumf %216, %217 : vector<8x128xf32>
    %c16_118 = arith.constant 16 : index
    %219 = memref.load %arg4[%c16_118] : memref<32xf32, #tpu.memory_space<smem>>
    %220 = vector.broadcast %219 : f32 to vector<8x128xf32>
    %221 = arith.mulf %218, %220 : vector<8x128xf32>
    %222 = arith.addf %209, %221 : vector<8x128xf32>
    %c0_119 = arith.constant 0 : index
    %c0_120 = arith.constant 0 : index
    %c17 = arith.constant 17 : index
    %223 = vector.load %arg2[%c0_119, %c0_120, %c17] : memref<1x8x32xf32, #tpu.memory_space<vmem>>, vector<1x8x1xf32>
    %224 = vector.shape_cast %223 : vector<1x8x1xf32> to vector<8x1xf32>
    %c0_121 = arith.constant 0 : index
    %c17_122 = arith.constant 17 : index
    %c0_123 = arith.constant 0 : index
    %225 = vector.load %arg3[%c0_121, %c17_122, %c0_123] : memref<1x32x128xf32, #tpu.memory_space<vmem>>, vector<1x1x128xf32>
    %226 = vector.shape_cast %225 : vector<1x1x128xf32> to vector<1x128xf32>
    %227 = vector.broadcast %224 : vector<8x1xf32> to vector<8x128xf32>
    %228 = vector.broadcast %226 : vector<1x128xf32> to vector<8x128xf32>
    %229 = arith.addf %227, %228 : vector<8x128xf32>
    %cst_124 = arith.constant 0.000000e+00 : f32
    %230 = vector.broadcast %cst_124 : f32 to vector<8x128xf32>
    %231 = arith.maximumf %229, %230 : vector<8x128xf32>
    %c17_125 = arith.constant 17 : index
    %232 = memref.load %arg4[%c17_125] : memref<32xf32, #tpu.memory_space<smem>>
    %233 = vector.broadcast %232 : f32 to vector<8x128xf32>
    %234 = arith.mulf %231, %233 : vector<8x128xf32>
    %235 = arith.addf %222, %234 : vector<8x128xf32>
    %c0_126 = arith.constant 0 : index
    %c0_127 = arith.constant 0 : index
    %c18 = arith.constant 18 : index
    %236 = vector.load %arg2[%c0_126, %c0_127, %c18] : memref<1x8x32xf32, #tpu.memory_space<vmem>>, vector<1x8x1xf32>
    %237 = vector.shape_cast %236 : vector<1x8x1xf32> to vector<8x1xf32>
    %c0_128 = arith.constant 0 : index
    %c18_129 = arith.constant 18 : index
    %c0_130 = arith.constant 0 : index
    %238 = vector.load %arg3[%c0_128, %c18_129, %c0_130] : memref<1x32x128xf32, #tpu.memory_space<vmem>>, vector<1x1x128xf32>
    %239 = vector.shape_cast %238 : vector<1x1x128xf32> to vector<1x128xf32>
    %240 = vector.broadcast %237 : vector<8x1xf32> to vector<8x128xf32>
    %241 = vector.broadcast %239 : vector<1x128xf32> to vector<8x128xf32>
    %242 = arith.addf %240, %241 : vector<8x128xf32>
    %cst_131 = arith.constant 0.000000e+00 : f32
    %243 = vector.broadcast %cst_131 : f32 to vector<8x128xf32>
    %244 = arith.maximumf %242, %243 : vector<8x128xf32>
    %c18_132 = arith.constant 18 : index
    %245 = memref.load %arg4[%c18_132] : memref<32xf32, #tpu.memory_space<smem>>
    %246 = vector.broadcast %245 : f32 to vector<8x128xf32>
    %247 = arith.mulf %244, %246 : vector<8x128xf32>
    %248 = arith.addf %235, %247 : vector<8x128xf32>
    %c0_133 = arith.constant 0 : index
    %c0_134 = arith.constant 0 : index
    %c19 = arith.constant 19 : index
    %249 = vector.load %arg2[%c0_133, %c0_134, %c19] : memref<1x8x32xf32, #tpu.memory_space<vmem>>, vector<1x8x1xf32>
    %250 = vector.shape_cast %249 : vector<1x8x1xf32> to vector<8x1xf32>
    %c0_135 = arith.constant 0 : index
    %c19_136 = arith.constant 19 : index
    %c0_137 = arith.constant 0 : index
    %251 = vector.load %arg3[%c0_135, %c19_136, %c0_137] : memref<1x32x128xf32, #tpu.memory_space<vmem>>, vector<1x1x128xf32>
    %252 = vector.shape_cast %251 : vector<1x1x128xf32> to vector<1x128xf32>
    %253 = vector.broadcast %250 : vector<8x1xf32> to vector<8x128xf32>
    %254 = vector.broadcast %252 : vector<1x128xf32> to vector<8x128xf32>
    %255 = arith.addf %253, %254 : vector<8x128xf32>
    %cst_138 = arith.constant 0.000000e+00 : f32
    %256 = vector.broadcast %cst_138 : f32 to vector<8x128xf32>
    %257 = arith.maximumf %255, %256 : vector<8x128xf32>
    %c19_139 = arith.constant 19 : index
    %258 = memref.load %arg4[%c19_139] : memref<32xf32, #tpu.memory_space<smem>>
    %259 = vector.broadcast %258 : f32 to vector<8x128xf32>
    %260 = arith.mulf %257, %259 : vector<8x128xf32>
    %261 = arith.addf %248, %260 : vector<8x128xf32>
    %c0_140 = arith.constant 0 : index
    %c0_141 = arith.constant 0 : index
    %c20 = arith.constant 20 : index
    %262 = vector.load %arg2[%c0_140, %c0_141, %c20] : memref<1x8x32xf32, #tpu.memory_space<vmem>>, vector<1x8x1xf32>
    %263 = vector.shape_cast %262 : vector<1x8x1xf32> to vector<8x1xf32>
    %c0_142 = arith.constant 0 : index
    %c20_143 = arith.constant 20 : index
    %c0_144 = arith.constant 0 : index
    %264 = vector.load %arg3[%c0_142, %c20_143, %c0_144] : memref<1x32x128xf32, #tpu.memory_space<vmem>>, vector<1x1x128xf32>
    %265 = vector.shape_cast %264 : vector<1x1x128xf32> to vector<1x128xf32>
    %266 = vector.broadcast %263 : vector<8x1xf32> to vector<8x128xf32>
    %267 = vector.broadcast %265 : vector<1x128xf32> to vector<8x128xf32>
    %268 = arith.addf %266, %267 : vector<8x128xf32>
    %cst_145 = arith.constant 0.000000e+00 : f32
    %269 = vector.broadcast %cst_145 : f32 to vector<8x128xf32>
    %270 = arith.maximumf %268, %269 : vector<8x128xf32>
    %c20_146 = arith.constant 20 : index
    %271 = memref.load %arg4[%c20_146] : memref<32xf32, #tpu.memory_space<smem>>
    %272 = vector.broadcast %271 : f32 to vector<8x128xf32>
    %273 = arith.mulf %270, %272 : vector<8x128xf32>
    %274 = arith.addf %261, %273 : vector<8x128xf32>
    %c0_147 = arith.constant 0 : index
    %c0_148 = arith.constant 0 : index
    %c21 = arith.constant 21 : index
    %275 = vector.load %arg2[%c0_147, %c0_148, %c21] : memref<1x8x32xf32, #tpu.memory_space<vmem>>, vector<1x8x1xf32>
    %276 = vector.shape_cast %275 : vector<1x8x1xf32> to vector<8x1xf32>
    %c0_149 = arith.constant 0 : index
    %c21_150 = arith.constant 21 : index
    %c0_151 = arith.constant 0 : index
    %277 = vector.load %arg3[%c0_149, %c21_150, %c0_151] : memref<1x32x128xf32, #tpu.memory_space<vmem>>, vector<1x1x128xf32>
    %278 = vector.shape_cast %277 : vector<1x1x128xf32> to vector<1x128xf32>
    %279 = vector.broadcast %276 : vector<8x1xf32> to vector<8x128xf32>
    %280 = vector.broadcast %278 : vector<1x128xf32> to vector<8x128xf32>
    %281 = arith.addf %279, %280 : vector<8x128xf32>
    %cst_152 = arith.constant 0.000000e+00 : f32
    %282 = vector.broadcast %cst_152 : f32 to vector<8x128xf32>
    %283 = arith.maximumf %281, %282 : vector<8x128xf32>
    %c21_153 = arith.constant 21 : index
    %284 = memref.load %arg4[%c21_153] : memref<32xf32, #tpu.memory_space<smem>>
    %285 = vector.broadcast %284 : f32 to vector<8x128xf32>
    %286 = arith.mulf %283, %285 : vector<8x128xf32>
    %287 = arith.addf %274, %286 : vector<8x128xf32>
    %c0_154 = arith.constant 0 : index
    %c0_155 = arith.constant 0 : index
    %c22 = arith.constant 22 : index
    %288 = vector.load %arg2[%c0_154, %c0_155, %c22] : memref<1x8x32xf32, #tpu.memory_space<vmem>>, vector<1x8x1xf32>
    %289 = vector.shape_cast %288 : vector<1x8x1xf32> to vector<8x1xf32>
    %c0_156 = arith.constant 0 : index
    %c22_157 = arith.constant 22 : index
    %c0_158 = arith.constant 0 : index
    %290 = vector.load %arg3[%c0_156, %c22_157, %c0_158] : memref<1x32x128xf32, #tpu.memory_space<vmem>>, vector<1x1x128xf32>
    %291 = vector.shape_cast %290 : vector<1x1x128xf32> to vector<1x128xf32>
    %292 = vector.broadcast %289 : vector<8x1xf32> to vector<8x128xf32>
    %293 = vector.broadcast %291 : vector<1x128xf32> to vector<8x128xf32>
    %294 = arith.addf %292, %293 : vector<8x128xf32>
    %cst_159 = arith.constant 0.000000e+00 : f32
    %295 = vector.broadcast %cst_159 : f32 to vector<8x128xf32>
    %296 = arith.maximumf %294, %295 : vector<8x128xf32>
    %c22_160 = arith.constant 22 : index
    %297 = memref.load %arg4[%c22_160] : memref<32xf32, #tpu.memory_space<smem>>
    %298 = vector.broadcast %297 : f32 to vector<8x128xf32>
    %299 = arith.mulf %296, %298 : vector<8x128xf32>
    %300 = arith.addf %287, %299 : vector<8x128xf32>
    %c0_161 = arith.constant 0 : index
    %c0_162 = arith.constant 0 : index
    %c23 = arith.constant 23 : index
    %301 = vector.load %arg2[%c0_161, %c0_162, %c23] : memref<1x8x32xf32, #tpu.memory_space<vmem>>, vector<1x8x1xf32>
    %302 = vector.shape_cast %301 : vector<1x8x1xf32> to vector<8x1xf32>
    %c0_163 = arith.constant 0 : index
    %c23_164 = arith.constant 23 : index
    %c0_165 = arith.constant 0 : index
    %303 = vector.load %arg3[%c0_163, %c23_164, %c0_165] : memref<1x32x128xf32, #tpu.memory_space<vmem>>, vector<1x1x128xf32>
    %304 = vector.shape_cast %303 : vector<1x1x128xf32> to vector<1x128xf32>
    %305 = vector.broadcast %302 : vector<8x1xf32> to vector<8x128xf32>
    %306 = vector.broadcast %304 : vector<1x128xf32> to vector<8x128xf32>
    %307 = arith.addf %305, %306 : vector<8x128xf32>
    %cst_166 = arith.constant 0.000000e+00 : f32
    %308 = vector.broadcast %cst_166 : f32 to vector<8x128xf32>
    %309 = arith.maximumf %307, %308 : vector<8x128xf32>
    %c23_167 = arith.constant 23 : index
    %310 = memref.load %arg4[%c23_167] : memref<32xf32, #tpu.memory_space<smem>>
    %311 = vector.broadcast %310 : f32 to vector<8x128xf32>
    %312 = arith.mulf %309, %311 : vector<8x128xf32>
    %313 = arith.addf %300, %312 : vector<8x128xf32>
    %c0_168 = arith.constant 0 : index
    %c0_169 = arith.constant 0 : index
    %c24 = arith.constant 24 : index
    %314 = vector.load %arg2[%c0_168, %c0_169, %c24] : memref<1x8x32xf32, #tpu.memory_space<vmem>>, vector<1x8x1xf32>
    %315 = vector.shape_cast %314 : vector<1x8x1xf32> to vector<8x1xf32>
    %c0_170 = arith.constant 0 : index
    %c24_171 = arith.constant 24 : index
    %c0_172 = arith.constant 0 : index
    %316 = vector.load %arg3[%c0_170, %c24_171, %c0_172] : memref<1x32x128xf32, #tpu.memory_space<vmem>>, vector<1x1x128xf32>
    %317 = vector.shape_cast %316 : vector<1x1x128xf32> to vector<1x128xf32>
    %318 = vector.broadcast %315 : vector<8x1xf32> to vector<8x128xf32>
    %319 = vector.broadcast %317 : vector<1x128xf32> to vector<8x128xf32>
    %320 = arith.addf %318, %319 : vector<8x128xf32>
    %cst_173 = arith.constant 0.000000e+00 : f32
    %321 = vector.broadcast %cst_173 : f32 to vector<8x128xf32>
    %322 = arith.maximumf %320, %321 : vector<8x128xf32>
    %c24_174 = arith.constant 24 : index
    %323 = memref.load %arg4[%c24_174] : memref<32xf32, #tpu.memory_space<smem>>
    %324 = vector.broadcast %323 : f32 to vector<8x128xf32>
    %325 = arith.mulf %322, %324 : vector<8x128xf32>
    %326 = arith.addf %313, %325 : vector<8x128xf32>
    %c0_175 = arith.constant 0 : index
    %c0_176 = arith.constant 0 : index
    %c25 = arith.constant 25 : index
    %327 = vector.load %arg2[%c0_175, %c0_176, %c25] : memref<1x8x32xf32, #tpu.memory_space<vmem>>, vector<1x8x1xf32>
    %328 = vector.shape_cast %327 : vector<1x8x1xf32> to vector<8x1xf32>
    %c0_177 = arith.constant 0 : index
    %c25_178 = arith.constant 25 : index
    %c0_179 = arith.constant 0 : index
    %329 = vector.load %arg3[%c0_177, %c25_178, %c0_179] : memref<1x32x128xf32, #tpu.memory_space<vmem>>, vector<1x1x128xf32>
    %330 = vector.shape_cast %329 : vector<1x1x128xf32> to vector<1x128xf32>
    %331 = vector.broadcast %328 : vector<8x1xf32> to vector<8x128xf32>
    %332 = vector.broadcast %330 : vector<1x128xf32> to vector<8x128xf32>
    %333 = arith.addf %331, %332 : vector<8x128xf32>
    %cst_180 = arith.constant 0.000000e+00 : f32
    %334 = vector.broadcast %cst_180 : f32 to vector<8x128xf32>
    %335 = arith.maximumf %333, %334 : vector<8x128xf32>
    %c25_181 = arith.constant 25 : index
    %336 = memref.load %arg4[%c25_181] : memref<32xf32, #tpu.memory_space<smem>>
    %337 = vector.broadcast %336 : f32 to vector<8x128xf32>
    %338 = arith.mulf %335, %337 : vector<8x128xf32>
    %339 = arith.addf %326, %338 : vector<8x128xf32>
    %c0_182 = arith.constant 0 : index
    %c0_183 = arith.constant 0 : index
    %c26 = arith.constant 26 : index
    %340 = vector.load %arg2[%c0_182, %c0_183, %c26] : memref<1x8x32xf32, #tpu.memory_space<vmem>>, vector<1x8x1xf32>
    %341 = vector.shape_cast %340 : vector<1x8x1xf32> to vector<8x1xf32>
    %c0_184 = arith.constant 0 : index
    %c26_185 = arith.constant 26 : index
    %c0_186 = arith.constant 0 : index
    %342 = vector.load %arg3[%c0_184, %c26_185, %c0_186] : memref<1x32x128xf32, #tpu.memory_space<vmem>>, vector<1x1x128xf32>
    %343 = vector.shape_cast %342 : vector<1x1x128xf32> to vector<1x128xf32>
    %344 = vector.broadcast %341 : vector<8x1xf32> to vector<8x128xf32>
    %345 = vector.broadcast %343 : vector<1x128xf32> to vector<8x128xf32>
    %346 = arith.addf %344, %345 : vector<8x128xf32>
    %cst_187 = arith.constant 0.000000e+00 : f32
    %347 = vector.broadcast %cst_187 : f32 to vector<8x128xf32>
    %348 = arith.maximumf %346, %347 : vector<8x128xf32>
    %c26_188 = arith.constant 26 : index
    %349 = memref.load %arg4[%c26_188] : memref<32xf32, #tpu.memory_space<smem>>
    %350 = vector.broadcast %349 : f32 to vector<8x128xf32>
    %351 = arith.mulf %348, %350 : vector<8x128xf32>
    %352 = arith.addf %339, %351 : vector<8x128xf32>
    %c0_189 = arith.constant 0 : index
    %c0_190 = arith.constant 0 : index
    %c27 = arith.constant 27 : index
    %353 = vector.load %arg2[%c0_189, %c0_190, %c27] : memref<1x8x32xf32, #tpu.memory_space<vmem>>, vector<1x8x1xf32>
    %354 = vector.shape_cast %353 : vector<1x8x1xf32> to vector<8x1xf32>
    %c0_191 = arith.constant 0 : index
    %c27_192 = arith.constant 27 : index
    %c0_193 = arith.constant 0 : index
    %355 = vector.load %arg3[%c0_191, %c27_192, %c0_193] : memref<1x32x128xf32, #tpu.memory_space<vmem>>, vector<1x1x128xf32>
    %356 = vector.shape_cast %355 : vector<1x1x128xf32> to vector<1x128xf32>
    %357 = vector.broadcast %354 : vector<8x1xf32> to vector<8x128xf32>
    %358 = vector.broadcast %356 : vector<1x128xf32> to vector<8x128xf32>
    %359 = arith.addf %357, %358 : vector<8x128xf32>
    %cst_194 = arith.constant 0.000000e+00 : f32
    %360 = vector.broadcast %cst_194 : f32 to vector<8x128xf32>
    %361 = arith.maximumf %359, %360 : vector<8x128xf32>
    %c27_195 = arith.constant 27 : index
    %362 = memref.load %arg4[%c27_195] : memref<32xf32, #tpu.memory_space<smem>>
    %363 = vector.broadcast %362 : f32 to vector<8x128xf32>
    %364 = arith.mulf %361, %363 : vector<8x128xf32>
    %365 = arith.addf %352, %364 : vector<8x128xf32>
    %c0_196 = arith.constant 0 : index
    %c0_197 = arith.constant 0 : index
    %c28 = arith.constant 28 : index
    %366 = vector.load %arg2[%c0_196, %c0_197, %c28] : memref<1x8x32xf32, #tpu.memory_space<vmem>>, vector<1x8x1xf32>
    %367 = vector.shape_cast %366 : vector<1x8x1xf32> to vector<8x1xf32>
    %c0_198 = arith.constant 0 : index
    %c28_199 = arith.constant 28 : index
    %c0_200 = arith.constant 0 : index
    %368 = vector.load %arg3[%c0_198, %c28_199, %c0_200] : memref<1x32x128xf32, #tpu.memory_space<vmem>>, vector<1x1x128xf32>
    %369 = vector.shape_cast %368 : vector<1x1x128xf32> to vector<1x128xf32>
    %370 = vector.broadcast %367 : vector<8x1xf32> to vector<8x128xf32>
    %371 = vector.broadcast %369 : vector<1x128xf32> to vector<8x128xf32>
    %372 = arith.addf %370, %371 : vector<8x128xf32>
    %cst_201 = arith.constant 0.000000e+00 : f32
    %373 = vector.broadcast %cst_201 : f32 to vector<8x128xf32>
    %374 = arith.maximumf %372, %373 : vector<8x128xf32>
    %c28_202 = arith.constant 28 : index
    %375 = memref.load %arg4[%c28_202] : memref<32xf32, #tpu.memory_space<smem>>
    %376 = vector.broadcast %375 : f32 to vector<8x128xf32>
    %377 = arith.mulf %374, %376 : vector<8x128xf32>
    %378 = arith.addf %365, %377 : vector<8x128xf32>
    %c0_203 = arith.constant 0 : index
    %c0_204 = arith.constant 0 : index
    %c29 = arith.constant 29 : index
    %379 = vector.load %arg2[%c0_203, %c0_204, %c29] : memref<1x8x32xf32, #tpu.memory_space<vmem>>, vector<1x8x1xf32>
    %380 = vector.shape_cast %379 : vector<1x8x1xf32> to vector<8x1xf32>
    %c0_205 = arith.constant 0 : index
    %c29_206 = arith.constant 29 : index
    %c0_207 = arith.constant 0 : index
    %381 = vector.load %arg3[%c0_205, %c29_206, %c0_207] : memref<1x32x128xf32, #tpu.memory_space<vmem>>, vector<1x1x128xf32>
    %382 = vector.shape_cast %381 : vector<1x1x128xf32> to vector<1x128xf32>
    %383 = vector.broadcast %380 : vector<8x1xf32> to vector<8x128xf32>
    %384 = vector.broadcast %382 : vector<1x128xf32> to vector<8x128xf32>
    %385 = arith.addf %383, %384 : vector<8x128xf32>
    %cst_208 = arith.constant 0.000000e+00 : f32
    %386 = vector.broadcast %cst_208 : f32 to vector<8x128xf32>
    %387 = arith.maximumf %385, %386 : vector<8x128xf32>
    %c29_209 = arith.constant 29 : index
    %388 = memref.load %arg4[%c29_209] : memref<32xf32, #tpu.memory_space<smem>>
    %389 = vector.broadcast %388 : f32 to vector<8x128xf32>
    %390 = arith.mulf %387, %389 : vector<8x128xf32>
    %391 = arith.addf %378, %390 : vector<8x128xf32>
    %c0_210 = arith.constant 0 : index
    %c0_211 = arith.constant 0 : index
    %c30 = arith.constant 30 : index
    %392 = vector.load %arg2[%c0_210, %c0_211, %c30] : memref<1x8x32xf32, #tpu.memory_space<vmem>>, vector<1x8x1xf32>
    %393 = vector.shape_cast %392 : vector<1x8x1xf32> to vector<8x1xf32>
    %c0_212 = arith.constant 0 : index
    %c30_213 = arith.constant 30 : index
    %c0_214 = arith.constant 0 : index
    %394 = vector.load %arg3[%c0_212, %c30_213, %c0_214] : memref<1x32x128xf32, #tpu.memory_space<vmem>>, vector<1x1x128xf32>
    %395 = vector.shape_cast %394 : vector<1x1x128xf32> to vector<1x128xf32>
    %396 = vector.broadcast %393 : vector<8x1xf32> to vector<8x128xf32>
    %397 = vector.broadcast %395 : vector<1x128xf32> to vector<8x128xf32>
    %398 = arith.addf %396, %397 : vector<8x128xf32>
    %cst_215 = arith.constant 0.000000e+00 : f32
    %399 = vector.broadcast %cst_215 : f32 to vector<8x128xf32>
    %400 = arith.maximumf %398, %399 : vector<8x128xf32>
    %c30_216 = arith.constant 30 : index
    %401 = memref.load %arg4[%c30_216] : memref<32xf32, #tpu.memory_space<smem>>
    %402 = vector.broadcast %401 : f32 to vector<8x128xf32>
    %403 = arith.mulf %400, %402 : vector<8x128xf32>
    %404 = arith.addf %391, %403 : vector<8x128xf32>
    %c0_217 = arith.constant 0 : index
    %c0_218 = arith.constant 0 : index
    %c31 = arith.constant 31 : index
    %405 = vector.load %arg2[%c0_217, %c0_218, %c31] : memref<1x8x32xf32, #tpu.memory_space<vmem>>, vector<1x8x1xf32>
    %406 = vector.shape_cast %405 : vector<1x8x1xf32> to vector<8x1xf32>
    %c0_219 = arith.constant 0 : index
    %c31_220 = arith.constant 31 : index
    %c0_221 = arith.constant 0 : index
    %407 = vector.load %arg3[%c0_219, %c31_220, %c0_221] : memref<1x32x128xf32, #tpu.memory_space<vmem>>, vector<1x1x128xf32>
    %408 = vector.shape_cast %407 : vector<1x1x128xf32> to vector<1x128xf32>
    %409 = vector.broadcast %406 : vector<8x1xf32> to vector<8x128xf32>
    %410 = vector.broadcast %408 : vector<1x128xf32> to vector<8x128xf32>
    %411 = arith.addf %409, %410 : vector<8x128xf32>
    %cst_222 = arith.constant 0.000000e+00 : f32
    %412 = vector.broadcast %cst_222 : f32 to vector<8x128xf32>
    %413 = arith.maximumf %411, %412 : vector<8x128xf32>
    %c31_223 = arith.constant 31 : index
    %414 = memref.load %arg4[%c31_223] : memref<32xf32, #tpu.memory_space<smem>>
    %415 = vector.broadcast %414 : f32 to vector<8x128xf32>
    %416 = arith.mulf %413, %415 : vector<8x128xf32>
    %417 = arith.addf %404, %416 : vector<8x128xf32>
    %cst_224 = arith.constant 0.000000e+00 : f32
    %418 = vector.broadcast %cst_224 : f32 to vector<8x128xf32>
    %419 = arith.maximumf %417, %418 : vector<8x128xf32>
    %420 = tpu.iota {dimensions = array<i32: 1>} : vector<8x128xi32>
    %c8_i32 = arith.constant 8 : i32
    %421 = vector.broadcast %c8_i32 : i32 to vector<8x128xi32>
    %422 = arith.cmpi slt, %420, %421 : vector<8x128xi32>
    %cst_225 = arith.constant 0.000000e+00 : f32
    %423 = vector.broadcast %cst_225 : f32 to vector<8x128xf32>
    %424 = arith.select %422, %419, %423 : vector<8x128xi1>, vector<8x128xf32>
    %cst_226 = arith.constant dense<0.000000e+00> : vector<8xf32>
    %425 = vector.multi_reduction <add>, %424, %cst_226 [1] : vector<8x128xf32> to vector<8xf32>
    %426 = vector.shape_cast %425 : vector<8xf32> to vector<8x1xf32>
    %cst_227 = arith.constant 9.99999996E-13 : f32
    %427 = vector.broadcast %cst_227 : f32 to vector<8x1xf32>
    %428 = arith.maximumf %426, %427 : vector<8x1xf32>
    %429 = tpu.reciprocal %428 {approx = true} : vector<8x1xf32> -> vector<8x1xf32>
    %430 = vector.broadcast %429 : vector<8x1xf32> to vector<8x128xf32>
    %431 = arith.mulf %424, %430 : vector<8x128xf32>
    %c0_228 = arith.constant 0 : index
    %c0_229 = arith.constant 0 : index
    %c0_230 = arith.constant 0 : index
    %432 = vector.load %arg6[%c0_228, %c0_229, %c0_230] : memref<1x8x128xf32, #tpu.memory_space<vmem>>, vector<1x8x128xf32>
    %433 = vector.shape_cast %432 : vector<1x8x128xf32> to vector<8x128xf32>
    %434 = vector.shape_cast %431 : vector<8x128xf32> to vector<1x8x128xf32>
    tpu.vector_store %arg6[%c0_228, %c0_229, %c0_230], %434 {strides = array<i32>} : memref<1x8x128xf32, #tpu.memory_space<vmem>>, vector<1x8x128xf32>,
    return
  }
  func.func @transform_0(%arg0: i32, %arg1: i32) -> (i32, i32, i32) {
    %c0_i32 = arith.constant 0 : i32
    %c0_i32_0 = arith.constant 0 : i32
    return %arg0, %arg1, %c0_i32 : i32, i32, i32
  }
  func.func @transform_1(%arg0: i32, %arg1: i32) -> (i32, i32, i32) {
    %c0_i32 = arith.constant 0 : i32
    %c0_i32_0 = arith.constant 0 : i32
    %c0_i32_1 = arith.constant 0 : i32
    return %arg0, %c0_i32, %c0_i32_0 : i32, i32, i32
  }
  func.func @transform_2(%arg0: i32, %arg1: i32) -> i32 {
    %c0_i32 = arith.constant 0 : i32
    %c0_i32_0 = arith.constant 0 : i32
    return %c0_i32 : i32
  }
  func.func @transform_3(%arg0: i32, %arg1: i32) -> i32 {
    %c0_i32 = arith.constant 0 : i32
    %c0_i32_0 = arith.constant 0 : i32
    return %c0_i32 : i32
  }
  func.func @transform_4(%arg0: i32, %arg1: i32) -> (i32, i32, i32) {
    %c0_i32 = arith.constant 0 : i32
    %c0_i32_0 = arith.constant 0 : i32
    return %arg0, %arg1, %c0_i32 : i32, i32, i32
  }
}

</mosaic_0001>

<bundles_post_ra>
// kernel: dsa_forward.1
= control target key start
LH: loop header
LB: loop body
LE: loop exit
PB: predicated region body
PF: predicated region fallthrough
CT: control target
= control target key end

     0   :  { %s1286_s0 = inlined_call_operand.vmem [shape: f32[2,8,32], index: 0, kind: input, shape index: {}]   ;;  %s1287_s1 = inlined_call_operand.vmem [shape: f32[2,32,128], index: 1, kind: input, shape index: {}]   ;;  %s1288_s2 = inlined_call_operand.vmem [shape: f32[32], index: 2, kind: input, shape index: {}]   ;;  %s1289_s3 = inlined_call_operand.<no memory space> [shape: f32[1], index: 3, kind: input, shape index: {}]   ;;  %s1290_s4 = inlined_call_operand.vmem [shape: f32[2,8,128], index: 4, kind: output, shape index: {}]  }
   0x1   :  { %9 = sst [smem:[#allocation2]] %s1289_s3 }
   0x2   :  { %10 = vsyncpa [#allocation4], 0  ;;  %s1136_s17 = smov 0   ;;  %s1138_s18 = smov 0  }
   0x3   :  { %s1140_s19 = smov 0  }
   0x4 LB: > { %s853_s3 = sadd.s32 4294967295, %s1073_s19   ;;  %s28_s20 = sadd.s32 1, %s1069_s18  ;;  %s1073_s19 = sphi %s1140_s19, %s16_s19   ;;  %s1069_s18 = sphi %s1138_s18, %s1294_s18   ;;  %s1065_s17 = sphi %s1136_s17, %s1293_s17  }
   0x5   : > { %p30_p0 = scmp.ge.s32.totalorder %s28_s20, 2  ;;  %p855_p1 = scmp.ge.s32.totalorder %s1073_s19, 1 }
   0x6   : > { %p157_p2 = scmp.lt.s32.totalorder %s1073_s19, 3  ;;  %p1161_p4 = scmp.eq.s32.totalorder %s853_s3, 0 }
   0x7   : > { %s1296_s20 = smov (%p30_p0, %s28_s20), 0  ;;  %s170_s25 = sshll.u32 %s1288_s2, 4  ;;  %s171_s25 = int_to_ptr.vmem [resolvable:$true] %s170_s25 }
   0x8   : > { %p1157_p3 = pnand %p855_p1, %p157_p2  ;;  %s1032_s26 = scalar_lea.vmem %s171_s25, 16 }
   0x9   : > { %p1033_p7 = scmp.ne.s32.totalorder %s171_s25, %s1032_s26  ;;  %p1040_p11 = scmp.lt.s32.totalorder %s171_s25, %s171_s25 }
   0xa   : > { %p934_p5 = pneg %p1157_p3  ;;  %p1041_p12 = scmp.lt.s32.totalorder %s1032_s26, %s1032_s26 }
   0xc   : > { %p935_p6 = pnand %p1161_p4, %p934_p5  ;;  %p1042_p13 = por %p1041_p12, %p1040_p11 }
   0xe   : > { %p1034_p8 = pneg %p935_p6 }
  0x10   : > { %p1035_p9 = pnand %p1034_p8, %p1033_p7 }
  0x12   : > { %p1036_p10 = pneg %p1035_p9 }
  0x14   : > { %p1043_p0 = pnand %p1042_p13, %p1036_p10 }
  0x16   : > { %1046 = shalt.err (!%p1043_p0)
}
  0x17   : > { %s1075_s27 = smov [#allocation3]   ;;  %204 = sbr.rel (%p1157_p3) target bundleno = 429 (0x1ad), region = 36 }
  0x18   : > { %937 = dma.vmem_to_smem (!%p935_p6), %s171_s25, 16, %s1075_s27, [#allocation4]  }
  0x1c   : > { %1060 = dma.done.wait (%p1161_p4), [#allocation4], 16  }
  0x1d   : > { %1062 = vsyncadd (%p1161_p4), [#allocation4], 4294967280 }
  0x1e   : > { %210 = sfence }
  0x1f   : > { %p240_p1 = scmp.lt.s32.totalorder %s1065_s17, 1  ;;  %v1076_v0 = vmov 2   ;;  %v1077_v1 = vmov 0   ;;  %v1078_v3 = vmov 3   ;;  %v1079_v4 = vmov 1   ;;  %s274_s7 = sld [smem:[#allocation3]] }
  0x20   : > { %999 = vset.pattern.permute.xlu1 %v1076_v0  ;;  %997 = vset.pattern.permute.xlu0 %v1077_v1  ;;  %v1080_v5 = vmov 4   ;;  %v1081_v6 = vmov 5   ;;  %v1082_v7 = vmov 6   ;;  %v1083_v8 = vmov 8   ;;  %s259_s11 = sld [smem:[#allocation2]] }
  0x21   : > { %s1298_s17 = smov (!%p240_p1, %s1065_s17), 1  ;;  %v1084_v9 = vmov 7   ;;  %v1085_v10 = vmov 11   ;;  %v1086_v11 = vmov 9   ;;  %v1087_v12 = vmov 14   ;;  %s866_s12 = sld [smem:[#allocation3 + $0x1]] }
  0x22   : > { %s860_s28 = sshll.u32 %s1298_s17, 3  ;;  %v1088_v13 = vmov 10   ;;  %v1089_v14 = vmov 17   ;;  %v1090_v15 = vmov 12   ;;  %v1091_v16 = vmov 20   ;;  %s929_s6 = sshll.u32 %s1298_s17, 5 }
  0x23   : > { %s246_s5 = scalar_lea.vmem %s1286_s0, %s860_s28  ;;  %v1092_v17 = vmov 13   ;;  %v1093_v18 = vmov 23   ;;  %v1094_v19 = vmov 15   ;;  %v1095_v20 = vmov 26   ;;  %s1226_s10 = scalar_lea.vmem %s1287_s1, %s929_s6 }
  0x24   : > { %v1188_v2 = vld [vmem:[%s246_s5] sm:$0xff]  ;;  %v1096_v21 = vmov 16   ;;  %v1097_v22 = vmov 29   ;;  %v1098_v23 = vmov 18   ;;  %v1099_v24 = vmov 31   ;;  %s1230_s13 = sld [smem:[#allocation3 + $0x2]] }
  0x25   : > { %295 = vperm.xlu1 %999, %v1188_v2   ;;  %265 = vperm.xlu0 %997, %v1188_v2   ;;  %v1100_v25 = vmov 19   ;;  %v1101_v26 = vmov 21   ;;  %v1102_v27 = vmov 22   ;;  %v1103_v28 = vmov 24   ;;  %v864_v33 = vld [vmem:[%s1226_s10] ss:$0 sm:$0xff] }
  0x26   : > { %v1104_v29 = vmov 25   ;;  %v1105_v30 = vmov 27   ;;  %v1106_v31 = vmov 28   ;;  %v1107_v32 = vmov 30   ;;  %v867_v36 = vld [vmem:[%s1226_s10 + $0x2] ss:$0 sm:$0xff] }
  0x27   : > { %v275_v38 = vstv %s274_s7  ;;  %v869_v39 = vld [vmem:[%s1226_s10 + $0x3] ss:$0 sm:$0xff]  ;;  %s1233_s14 = sld [smem:[#allocation3 + $0x3]]  ;;  %v865_v41 = vld [vmem:[%s1226_s10 + $0x1] ss:$0 sm:$0xff]  ;;  %v260_v43 = vstv %s259_s11 }
  0x28   : > { %s1236_s15 = sld [smem:[#allocation3 + $0x4]]  ;;  %v290_v49 = vstv %s866_s12  ;;  %v871_v53 = vld [vmem:[%s1226_s10 + $0x4] ss:$0 sm:$0xff]  ;;  %v873_v54 = vld [vmem:[%s1226_s10 + $0x5] ss:$0 sm:$0xff] }
  0x29   : > { %1000 = vset.pattern.permute.xlu1 %v1078_v3  ;;  %998 = vset.pattern.permute.xlu0 %v1079_v4  ;;  %s1238_s16 = sld [smem:[#allocation3 + $0x5]]  ;;  %v875_v4 = vld [vmem:[%s1226_s10 + $0x6] ss:$0 sm:$0xff] }
  0x2a   : > { %310 = vperm.xlu1 %1000, %v1188_v2   ;;  %280 = vperm.xlu0 %998, %v1188_v2   ;;  %v305_v55 = vstv %s1230_s13  ;;  %s876_s3 = sld [smem:[#allocation3 + $0x6]] }
  0x2b   : > { %s878_s21 = sld [smem:[#allocation3 + $0x7]] }
  0x2c   : > { %s880_s22 = sld [smem:[#allocation3 + $0x8]] }
  0x2d   : > { %v320_v60 = vstv %s1233_s14  ;;  %s882_s23 = sld [smem:[#allocation3 + $0x9]] }
  0x2e   : > { %1001 = vset.pattern.permute.xlu1 %v1080_v5  ;;  %1002 = vset.pattern.permute.xlu0 %v1081_v6  ;;  %v335_v1 = vstv %s1236_s15  ;;  %s884_s24 = sld [smem:[#allocation3 + $0xa]] }
  0x2f   : > { %325 = vperm.xlu1 %1001, %v1188_v2   ;;  %340 = vperm.xlu0 %1002, %v1188_v2   ;;  %s886_s25 = sld [smem:[#allocation3 + $0xb]] }
  0x30   : > { %s888_s26 = sld [smem:[#allocation3 + $0xc]] }
  0x31   : > { %s890_s27 = sld [smem:[#allocation3 + $0xd]] }
  0x32   : > { %s892_s29 = sld [smem:[#allocation3 + $0xe]] }
  0x33   : > { %1003 = vset.pattern.permute.xlu1 %v1082_v7  ;;  %1005 = vset.pattern.permute.xlu0 %v1083_v8  ;;  %v350_v7 = vstv %s1238_s16  ;;  %s894_s30 = sld [smem:[#allocation3 + $0xf]] }
  0x34   : > { %355 = vperm.xlu1 %1003, %v1188_v2   ;;  %385 = vperm.xlu0 %1005, %v1188_v2   ;;  %s896_s5 = sld [smem:[#allocation3 + $0x10]] }
  0x35   : > { %s898_s6 = sld [smem:[#allocation3 + $0x11]] }
  0x36   : > { %s900_s7 = sld [smem:[#allocation3 + $0x12]] }
  0x37   : > { %s902_s8 = sld [smem:[#allocation3 + $0x13]] }
  0x38   : > { %1004 = vset.pattern.permute.xlu1 %v1084_v9  ;;  %1008 = vset.pattern.permute.xlu0 %v1085_v10  ;;  %s904_s9 = sld [smem:[#allocation3 + $0x14]] }
  0x39   : > { %370 = vperm.xlu1 %1004, %v1188_v2   ;;  %430 = vperm.xlu0 %1008, %v1188_v2   ;;  %s906_s11 = sld [smem:[#allocation3 + $0x15]] }
  0x3a   : > { %s908_s12 = sld [smem:[#allocation3 + $0x16]] }
  0x3b   : > { %s910_s13 = sld [smem:[#allocation3 + $0x17]] }
  0x3c   : > { %s912_s14 = sld [smem:[#allocation3 + $0x18]] }
  0x3d   : > { %1006 = vset.pattern.permute.xlu1 %v1086_v11  ;;  %1011 = vset.pattern.permute.xlu0 %v1087_v12  ;;  %v879_v12 = vld [vmem:[%s1226_s10 + $0x8] ss:$0 sm:$0xff]  ;;  %s914_s15 = sld [smem:[#allocation3 + $0x19]] }
  0x3e   : > { %400 = vperm.xlu1 %1006, %v1188_v2   ;;  %475 = vperm.xlu0 %1011, %v1188_v2   ;;  %s916_s16 = sld [smem:[#allocation3 + $0x1a]] }
  0x42   : > { %1007 = vset.pattern.permute.xlu1 %v1088_v13  ;;  %1014 = vset.pattern.permute.xlu0 %v1089_v14 }
  0x43   : > { %415 = vperm.xlu1 %1007, %v1188_v2   ;;  %520 = vperm.xlu0 %1014, %v1188_v2  }
  0x47   : > { %1009 = vset.pattern.permute.xlu1 %v1090_v15  ;;  %1017 = vset.pattern.permute.xlu0 %v1091_v16  ;;  %v365_v16 = vstv %s876_s3  ;;  %s918_s3 = sld [smem:[#allocation3 + $0x1b]] }
  0x48   : > { %445 = vperm.xlu1 %1009, %v1188_v2   ;;  %565 = vperm.xlu0 %1017, %v1188_v2  }
  0x4c   : > { %1010 = vset.pattern.permute.xlu1 %v1092_v17  ;;  %1020 = vset.pattern.permute.xlu0 %v1093_v18  ;;  %v877_v18 = vld [vmem:[%s1226_s10 + $0x7] ss:$0 sm:$0xff] }
  0x4d   : > { %460 = vperm.xlu1 %1010, %v1188_v2   ;;  %610 = vperm.xlu0 %1020, %v1188_v2  }
  0x51   : > { %1012 = vset.pattern.permute.xlu1 %v1094_v19  ;;  %1023 = vset.pattern.permute.xlu0 %v1095_v20 }
  0x52   : > { %490 = vperm.xlu1 %1012, %v1188_v2   ;;  %655 = vperm.xlu0 %1023, %v1188_v2  }
  0x56   : > { %1013 = vset.pattern.permute.xlu1 %v1096_v21  ;;  %1026 = vset.pattern.permute.xlu0 %v1097_v22 }
  0x57   : > { %505 = vperm.xlu1 %1013, %v1188_v2   ;;  %700 = vperm.xlu0 %1026, %v1188_v2  }
  0x5b   : > { %1015 = vset.pattern.permute.xlu1 %v1098_v23  ;;  %1029 = vset.pattern.permute.xlu0 %v1099_v24 }
  0x5c   : > { %535 = vperm.xlu1 %1015, %v1188_v2  }
  0x60   : > { %1016 = vset.pattern.permute.xlu1 %v1100_v25 }
  0x61   : > { %550 = vperm.xlu1 %1016, %v1188_v2  }
  0x65   : > { %1018 = vset.pattern.permute.xlu1 %v1101_v26 }
  0x66   : > { %580 = vperm.xlu1 %1018, %v1188_v2  }
  0x6a   : > { %1019 = vset.pattern.permute.xlu1 %v1102_v27  ;;  %v881_v27 = vld [vmem:[%s1226_s10 + $0x9] ss:$0 sm:$0xff] }
  0x6b   : > { %595 = vperm.xlu1 %1019, %v1188_v2  }
  0x6f   : > { %1021 = vset.pattern.permute.xlu1 %v1103_v28  ;;  %v395_v28 = vstv %s880_s22  ;;  %s922_s22 = sld [smem:[#allocation3 + $0x1d]] }
  0x70   : > { %625 = vperm.xlu1 %1021, %v1188_v2  }
  0x74   : > { %1022 = vset.pattern.permute.xlu1 %v1104_v29 }
  0x75   : > { %640 = vperm.xlu1 %1022, %v1188_v2  }
  0x79   : > { %1024 = vset.pattern.permute.xlu1 %v1105_v30 }
  0x7a   : > { %670 = vperm.xlu1 %1024, %v1188_v2  }
  0x7e   : > { %1025 = vset.pattern.permute.xlu1 %v1106_v31 }
  0x7f   : > { %685 = vperm.xlu1 %1025, %v1188_v2  }
  0x83   : > { %1027 = vset.pattern.permute.xlu1 %v1107_v32 }
  0x84   : > { %715 = vperm.xlu1 %1027, %v1188_v2  }
  0x88   : > { %1028 = vset.pattern.permute.xlu1 %v1099_v24  ;;  %v380_v24 = vstv %s878_s21  ;;  %s920_s21 = sld [smem:[#allocation3 + $0x1c]] }
  0x89   : > { %730 = vperm.xlu1 %1028, %v1188_v2  }
  0xa0   : > { %v296_v34 = vpop.permute.xlu1 %295  ;;  %v266_v35 = vpop.permute.xlu0 %265 }
  0xa1   : > { %v272_v37 = vadd.f32 %v864_v33, %v266_v35  ;;  %v302_v42 = vadd.f32 %v867_v36, %v296_v34  ;;  %v885_v33 = vld [vmem:[%s1226_s10 + $0xb] ss:$0 sm:$0xff] }
  0xa3   : > { %v273_v40 = vmax.f32 %v272_v37, 0.0  ;;  %v303_v50 = vmax.f32 %v302_v42, 0.0  ;;  %v410_v37 = vstv %s882_s23  ;;  %s924_s23 = sld [smem:[#allocation3 + $0x1e]] }
  0xa5   : > { %v276_v44 = vmul.f32 %v275_v38, %v273_v40  ;;  %v311_v45 = vpop.permute.xlu1 %310  ;;  %v281_v46 = vpop.permute.xlu0 %280  ;;  %v306_v63 = vmul.f32 %v305_v55, %v303_v50 }
  0xa6   : > { %v317_v47 = vadd.f32 %v869_v39, %v311_v45  ;;  %v287_v48 = vadd.f32 %v865_v41, %v281_v46  ;;  %v883_v39 = vld [vmem:[%s1226_s10 + $0xa] ss:$0 sm:$0xff]  ;;  %v425_v45 = vstv %s884_s24  ;;  %s926_s24 = sld [smem:[#allocation3 + $0x1f]] }
  0xa7   : > { %v277_v51 = vadd.f32 %v276_v44, %v260_v43 }
  0xa8   : > { %v288_v52 = vmax.f32 %v287_v48, 0.0  ;;  %v318_v56 = vmax.f32 %v317_v47, 0.0  ;;  %v887_v48 = vld [vmem:[%s1226_s10 + $0xc] ss:$0 sm:$0xff] }
  0xaa   : > { %v291_v57 = vmul.f32 %v290_v49, %v288_v52  ;;  %v326_v58 = vpop.permute.xlu1 %325  ;;  %v341_v59 = vpop.permute.xlu0 %340  ;;  %v321_v5 = vmul.f32 %v320_v60, %v318_v56  ;;  %v440_v49 = vstv %s886_s25  ;;  %v889_v60 = vld [vmem:[%s1226_s10 + $0xd] ss:$0 sm:$0xff] }
  0xab   : > { %v332_v61 = vadd.f32 %v871_v53, %v326_v58  ;;  %v347_v62 = vadd.f32 %v873_v54, %v341_v59  ;;  %v891_v54 = vld [vmem:[%s1226_s10 + $0xe] ss:$0 sm:$0xff]  ;;  %v455_v58 = vstv %s888_s26  ;;  %s258_s26 = scalar_lea.vmem %s1290_s4, %s860_s28 }
  0xac   : > { %v292_v0 = vadd.f32 %v291_v57, %v277_v51 }
  0xad   : > { %v333_v2 = vmax.f32 %v332_v61, 0.0  ;;  %v348_v3 = vmax.f32 %v347_v62, 0.0 }
  0xae   : > { %v307_v6 = vadd.f32 %v306_v63, %v292_v0 }
  0xaf   : > { %v336_v8 = vmul.f32 %v335_v1, %v333_v2  ;;  %v356_v9 = vpop.permute.xlu1 %355  ;;  %v386_v13 = vpop.permute.xlu0 %385  ;;  %v351_v14 = vmul.f32 %v350_v7, %v348_v3  ;;  %v470_v2 = vstv %s890_s27 }
  0xb0   : > { %v322_v10 = vadd.f32 %v321_v5, %v307_v6  ;;  %v362_v11 = vadd.f32 %v875_v4, %v356_v9  ;;  %v392_v19 = vadd.f32 %v879_v12, %v386_v13  ;;  %v893_v5 = vld [vmem:[%s1226_s10 + $0xf] ss:$0 sm:$0xff]  ;;  %v485_v6 = vstv %s892_s29 }
  0xb2   : > { %v337_v15 = vadd.f32 %v336_v8, %v322_v10  ;;  %v363_v17 = vmax.f32 %v362_v11, 0.0  ;;  %v393_v26 = vmax.f32 %v392_v19, 0.0  ;;  %v897_v11 = vld [vmem:[%s1226_s10 + $0x11] ss:$0 sm:$0xff] }
  0xb4   : > { %v371_v20 = vpop.permute.xlu1 %370  ;;  %v352_v21 = vadd.f32 %v351_v14, %v337_v15  ;;  %v366_v22 = vmul.f32 %v365_v16, %v363_v17  ;;  %v431_v34 = vpop.permute.xlu0 %430  ;;  %v396_v36 = vmul.f32 %v395_v28, %v393_v26  ;;  %v500_v15 = vstv %s894_s30  ;;  %v895_v17 = vld [vmem:[%s1226_s10 + $0x10] ss:$0 sm:$0xff]  ;;  %v899_v26 = vld [vmem:[%s1226_s10 + $0x12] ss:$0 sm:$0xff] }
  0xb5   : > { %v377_v23 = vadd.f32 %v877_v18, %v371_v20  ;;  %v437_v40 = vadd.f32 %v885_v33, %v431_v34 }
  0xb6   : > { %v367_v29 = vadd.f32 %v366_v22, %v352_v21 }
  0xb7   : > { %v378_v25 = vmax.f32 %v377_v23, 0.0  ;;  %v438_v47 = vmax.f32 %v437_v40, 0.0  ;;  %v515_v23 = vstv %s896_s5 }
  0xb9   : > { %v381_v30 = vmul.f32 %v380_v24, %v378_v25  ;;  %v401_v31 = vpop.permute.xlu1 %400  ;;  %v476_v55 = vpop.permute.xlu0 %475  ;;  %v441_v57 = vmul.f32 %v440_v49, %v438_v47  ;;  %v905_v47 = vld [vmem:[%s1226_s10 + $0x15] ss:$0 sm:$0xff] }
  0xba   : > { %v407_v32 = vadd.f32 %v881_v27, %v401_v31  ;;  %v482_v61 = vadd.f32 %v891_v54, %v476_v55  ;;  %v530_v27 = vstv %s898_s6 }
  0xbb   : > { %v382_v35 = vadd.f32 %v381_v30, %v367_v29 }
  0xbc   : > { %v408_v38 = vmax.f32 %v407_v32, 0.0  ;;  %v483_v4 = vmax.f32 %v482_v61, 0.0  ;;  %v903_v32 = vld [vmem:[%s1226_s10 + $0x14] ss:$0 sm:$0xff] }
  0xbd   : > { %v397_v42 = vadd.f32 %v396_v36, %v382_v35  ;;  %v545_v36 = vstv %s900_s7 }
  0xbe   : > { %v416_v41 = vpop.permute.xlu1 %415  ;;  %v411_v43 = vmul.f32 %v410_v37, %v408_v38  ;;  %v521_v12 = vpop.permute.xlu0 %520  ;;  %v486_v14 = vmul.f32 %v485_v6, %v483_v4  ;;  %v901_v38 = vld [vmem:[%s1226_s10 + $0x13] ss:$0 sm:$0xff]  ;;  %v911_v4 = vld [vmem:[%s1226_s10 + $0x18] ss:$0 sm:$0xff] }
  0xbf   : > { %v422_v44 = vadd.f32 %v883_v39, %v416_v41  ;;  %v527_v18 = vadd.f32 %v897_v11, %v521_v12 }
  0xc0   : > { %v412_v50 = vadd.f32 %v411_v43, %v397_v42 }
  0xc1   : > { %v423_v46 = vmax.f32 %v422_v44, 0.0  ;;  %v528_v25 = vmax.f32 %v527_v18, 0.0  ;;  %v560_v44 = vstv %s902_s8 }
  0xc3   : > { %v426_v51 = vmul.f32 %v425_v45, %v423_v46  ;;  %v446_v52 = vpop.permute.xlu1 %445  ;;  %v566_v33 = vpop.permute.xlu0 %565  ;;  %v531_v35 = vmul.f32 %v530_v27, %v528_v25  ;;  %v917_v25 = vld [vmem:[%s1226_s10 + $0x1b] ss:$0 sm:$0xff] }
  0xc4   : > { %v452_v53 = vadd.f32 %v887_v48, %v446_v52  ;;  %v572_v39 = vadd.f32 %v903_v32, %v566_v33  ;;  %v575_v48 = vstv %s904_s9 }
  0xc5   : > { %v427_v56 = vadd.f32 %v426_v51, %v412_v50 }
  0xc6   : > { %v453_v59 = vmax.f32 %v452_v53, 0.0  ;;  %v573_v46 = vmax.f32 %v572_v39, 0.0  ;;  %v909_v53 = vld [vmem:[%s1226_s10 + $0x17] ss:$0 sm:$0xff] }
  0xc7   : > { %v442_v63 = vadd.f32 %v441_v57, %v427_v56  ;;  %v590_v57 = vstv %s906_s11 }
  0xc8   : > { %v461_v62 = vpop.permute.xlu1 %460  ;;  %v456_v0 = vmul.f32 %v455_v58, %v453_v59  ;;  %v611_v54 = vpop.permute.xlu0 %610  ;;  %v576_v56 = vmul.f32 %v575_v48, %v573_v46  ;;  %v907_v59 = vld [vmem:[%s1226_s10 + $0x16] ss:$0 sm:$0xff]  ;;  %v923_v46 = vld [vmem:[%s1226_s10 + $0x1e] ss:$0 sm:$0xff] }
  0xc9   : > { %v467_v1 = vadd.f32 %v889_v60, %v461_v62  ;;  %v617_v60 = vadd.f32 %v909_v53, %v611_v54  ;;  %v725_v54 = vstv %s924_s23 }
  0xca   : > { %v457_v7 = vadd.f32 %v456_v0, %v442_v63 }
  0xcb   : > { %v468_v3 = vmax.f32 %v467_v1, 0.0  ;;  %v605_v1 = vstv %s908_s12 }
  0xcd   : > { %v471_v8 = vmul.f32 %v470_v2, %v468_v3  ;;  %v491_v9 = vpop.permute.xlu1 %490  ;;  %v618_v3 = vmax.f32 %v617_v60, 0.0  ;;  %v656_v11 = vpop.permute.xlu0 %655 }
  0xce   : > { %v497_v10 = vadd.f32 %v893_v5, %v491_v9  ;;  %v620_v5 = vstv %s910_s13 }
  0xcf   : > { %v472_v13 = vadd.f32 %v471_v8, %v457_v7 }
  0xd0   : > { %v498_v16 = vmax.f32 %v497_v10, 0.0  ;;  %v915_v10 = vld [vmem:[%s1226_s10 + $0x1a] ss:$0 sm:$0xff] }
  0xd1   : > { %v487_v20 = vadd.f32 %v486_v14, %v472_v13  ;;  %v621_v13 = vmul.f32 %v620_v5, %v618_v3  ;;  %v635_v14 = vstv %s912_s14 }
  0xd2   : > { %v506_v19 = vpop.permute.xlu1 %505  ;;  %v501_v21 = vmul.f32 %v500_v15, %v498_v16  ;;  %v913_v16 = vld [vmem:[%s1226_s10 + $0x19] ss:$0 sm:$0xff]  ;;  %v701_v32 = vpop.permute.xlu0 %700 }
  0xd3   : > { %v512_v22 = vadd.f32 %v895_v17, %v506_v19  ;;  %v662_v17 = vadd.f32 %v915_v10, %v656_v11 }
  0xd4   : > { %v502_v28 = vadd.f32 %v501_v21, %v487_v20 }
  0xd5   : > { %v513_v24 = vmax.f32 %v512_v22, 0.0  ;;  %v650_v22 = vstv %s914_s15 }
  0xd7   : > { %v516_v29 = vmul.f32 %v515_v23, %v513_v24  ;;  %v536_v30 = vpop.permute.xlu1 %535  ;;  %v663_v24 = vmax.f32 %v662_v17, 0.0 }
  0xd8   : > { %v542_v31 = vadd.f32 %v899_v26, %v536_v30  ;;  %v665_v26 = vstv %s916_s16 }
  0xd9   : > { %v517_v34 = vadd.f32 %v516_v29, %v502_v28 }
  0xda   : > { %v543_v37 = vmax.f32 %v542_v31, 0.0  ;;  %v921_v31 = vld [vmem:[%s1226_s10 + $0x1d] ss:$0 sm:$0xff] }
  0xdb   : > { %v532_v41 = vadd.f32 %v531_v35, %v517_v34  ;;  %v666_v34 = vmul.f32 %v665_v26, %v663_v24  ;;  %v680_v35 = vstv %s918_s3 }
  0xdc   : > { %v551_v40 = vpop.permute.xlu1 %550  ;;  %v546_v42 = vmul.f32 %v545_v36, %v543_v37  ;;  %v919_v37 = vld [vmem:[%s1226_s10 + $0x1c] ss:$0 sm:$0xff] }
  0xdd   : > { %v557_v43 = vadd.f32 %v901_v38, %v551_v40  ;;  %v707_v38 = vadd.f32 %v921_v31, %v701_v32 }
  0xde   : > { %v547_v49 = vadd.f32 %v546_v42, %v532_v41 }
  0xdf   : > { %v558_v45 = vmax.f32 %v557_v43, 0.0  ;;  %v695_v43 = vstv %s920_s21 }
  0xe1   : > { %v561_v50 = vmul.f32 %v560_v44, %v558_v45  ;;  %v581_v51 = vpop.permute.xlu1 %580  ;;  %v708_v45 = vmax.f32 %v707_v38, 0.0 }
  0xe2   : > { %v587_v52 = vadd.f32 %v905_v47, %v581_v51  ;;  %v710_v47 = vstv %s922_s22 }
  0xe3   : > { %v562_v55 = vadd.f32 %v561_v50, %v547_v49  ;;  %v711_v53 = vmul.f32 %v710_v47, %v708_v45 }
  0xe4   : > { %v588_v58 = vmax.f32 %v587_v52, 0.0 }
  0xe5   : > { %v577_v62 = vadd.f32 %v576_v56, %v562_v55  ;;  %v925_v56 = vld [vmem:[%s1226_s10 + $0x1f] ss:$0 sm:$0xff] }
  0xe6   : > { %v596_v61 = vpop.permute.xlu1 %595  ;;  %v591_v63 = vmul.f32 %v590_v57, %v588_v58  ;;  %v744_v58 = vlaneseq }
  0xe7   : > { %v602_v0 = vadd.f32 %v907_v59, %v596_v61 }
  0xe8   : > { %v592_v6 = vadd.f32 %v591_v63, %v577_v62  ;;  %v740_v62 = vstv %s926_s24 }
  0xe9   : > { %v603_v2 = vmax.f32 %v602_v0, 0.0  ;;  %v745_v0 = vand.u32 127, %v744_v58 }
  0xeb   : > { %v606_v7 = vmul.f32 %v605_v1, %v603_v2  ;;  %v626_v8 = vpop.permute.xlu1 %625  ;;  %vm746_vm0 = vcmp.lt.s32.totalorder %v745_v0, 8 }
  0xec   : > { %v632_v9 = vadd.f32 %v911_v4, %v626_v8 }
  0xed   : > { %v607_v12 = vadd.f32 %v606_v7, %v592_v6 }
  0xee   : > { %v633_v15 = vmax.f32 %v632_v9, 0.0 }
  0xef   : > { %v622_v19 = vadd.f32 %v621_v13, %v607_v12 }
  0xf0   : > { %v641_v18 = vpop.permute.xlu1 %640  ;;  %v636_v20 = vmul.f32 %v635_v14, %v633_v15 }
  0xf1   : > { %v647_v21 = vadd.f32 %v913_v16, %v641_v18 }
  0xf2   : > { %v637_v27 = vadd.f32 %v636_v20, %v622_v19 }
  0xf3   : > { %v648_v23 = vmax.f32 %v647_v21, 0.0 }
  0xf5   : > { %v651_v28 = vmul.f32 %v650_v22, %v648_v23  ;;  %v671_v29 = vpop.permute.xlu1 %670 }
  0xf6   : > { %v677_v30 = vadd.f32 %v917_v25, %v671_v29 }
  0xf7   : > { %v652_v33 = vadd.f32 %v651_v28, %v637_v27 }
  0xf8   : > { %v678_v36 = vmax.f32 %v677_v30, 0.0 }
  0xf9   : > { %v667_v40 = vadd.f32 %v666_v34, %v652_v33 }
  0xfa   : > { %v686_v39 = vpop.permute.xlu1 %685  ;;  %v681_v41 = vmul.f32 %v680_v35, %v678_v36 }
  0xfb   : > { %v692_v42 = vadd.f32 %v919_v37, %v686_v39 }
  0xfc   : > { %v682_v48 = vadd.f32 %v681_v41, %v667_v40 }
  0xfd   : > { %v693_v44 = vmax.f32 %v692_v42, 0.0 }
  0xff   : > { %v696_v49 = vmul.f32 %v695_v43, %v693_v44  ;;  %v716_v50 = vpop.permute.xlu1 %715 }
 0x100   : > { %v722_v51 = vadd.f32 %v923_v46, %v716_v50 }
 0x101   : > { %v697_v52 = vadd.f32 %v696_v49, %v682_v48 }
 0x102   : > { %v723_v55 = vmax.f32 %v722_v51, 0.0 }
 0x103   : > { %v712_v59 = vadd.f32 %v711_v53, %v697_v52 }
 0x104   : > { %v731_v57 = vpop.permute.xlu1 %730  ;;  %v726_v60 = vmul.f32 %v725_v54, %v723_v55 }
 0x105   : > { %v737_v61 = vadd.f32 %v925_v56, %v731_v57 }
 0x106   : > { %v727_v2 = vadd.f32 %v726_v60, %v712_v59 }
 0x107   : > { %v738_v63 = vmax.f32 %v737_v61, 0.0 }
 0x109   : > { %v741_v1 = vmul.f32 %v740_v62, %v738_v63 }
 0x10b   : > { %v742_v3 = vadd.f32 %v741_v1, %v727_v2 }
 0x10d   : > { %v743_v4 = vmax.f32 %v742_v3, 0.0 }
 0x10f   : > { %v747_v5 = vsel %vm746_vm0, %v743_v4, 0.0 }
 0x110   : > { %748 = vadd.xlane.f32.xlu0 %v747_v5 }
 0x199   : > { %v749_v6 = vpop.xlane.xlu0 %748 }
 0x19a   : > { %v750_v7 = vmax.f32 %v749_v6, 1e-12 }
 0x19c   : > { %1030 = vrcp.f32 %v750_v7 }
 0x1a9   : > { %v1031_v8 = vpop.eup %1030 }
 0x1aa   : > { %v752_v9 = vmul.f32 %v1031_v8, %v747_v5 }
 0x1ac   : > { %753 = vst [vmem:[%s258_s26] sm:$0xff] %v752_v9 }
 0x1ad PF: > { %s16_s19 = sadd.s32 1, %s1073_s19   ;;  %s1293_s17 = smov %s1069_s18 }
 0x1ae   : > { %p13_p2 = scmp.ge.s32.totalorder %s16_s19, 4   ;;  %s1294_s18 = smov %s1296_s20 }
 0x1b0   :  { %15 = sbr.rel (!%p13_p2) target bundleno = 4 (0x4), region = 74 }
 0x1b5   :  { %779 = vsyncpa [#allocation4], 1 }
 0x1b6   :  { %781 = vsyncpa [#allocation4 + $0x1], 1 }

</bundles_post_ra>
